<compile_context>
chip_gen: v6e
topology: v6e:2x2x1
jax: 0.10.0
libtpu: 0.0.40
codegen_flags: <defaults>
</compile_context>

<pallas_src>
import functools
import math

import jax
import jax.numpy as jnp
from jax.experimental import pallas as pl
from jax.experimental.pallas import tpu as pltpu

_VMEM_LIMIT = 32 * 1024 * 1024   # safe on v5e/v6e (128 MiB) and v7x (64 MiB physical)


def _round_up(x, m):
    return ((x + m - 1) // m) * m


def bn_fold(bn, eps=1e-5):
    """Inference-mode BatchNorm folded to (scale, shift)."""
    scale = bn["gamma"] / jnp.sqrt(bn["var"] + eps)
    shift = bn["beta"] - bn["mean"] * scale
    return scale, shift


def _fold_1x1(w, bn):
    """(Cout,Cin,1,1) conv + BN -> (Cin,Cout) weight (f32) and (Cout,) bias."""
    scale, shift = bn_fold(bn)
    return w[:, :, 0, 0].T * scale[None, :], shift


# ----------------------------------------------------------------------------
# Kernel 1: fused matmul + BN-shift bias + optional ReLU (1x1 convs)
# ----------------------------------------------------------------------------
def _mm_bias_act_kernel(a_ref, b_ref, bias_ref, o_ref, *, relu):
    a = a_ref[...]
    if a.dtype != jnp.bfloat16:
        a = a.astype(jnp.bfloat16)               # in-kernel cast: no extra HBM pass
    acc = jnp.dot(a, b_ref[...], preferred_element_type=jnp.float32)
    acc = acc + bias_ref[...]
    if relu:
        acc = jnp.maximum(acc, 0.0)
    o_ref[...] = acc.astype(o_ref.dtype)


def pallas_matmul_bias_act(a, b, bias, *, relu, out_dtype):
    """(M,K)@(K,N) + bias(N,) (+ReLU).  Full-K blocks (no K pad / K grid axis),
    no N padding (full-dim N block when N%128 != 0), bf16 MXU operands, f32 acc."""
    M, K = a.shape
    K2, N = b.shape
    assert K == K2 and bias.shape == (N,)

    # M tiling: >=2 tiles whenever possible (keeps both v7x TensorCores busy).
    if M >= 1024:
        tm = 256
        Mp = _round_up(M, 256)
    elif M >= 16:
        tm = _round_up((M + 1) // 2, 16)
        Mp = 2 * tm
    else:
        tm = _round_up(M, 8)
        Mp = tm

    # N tiling: 256/512-wide where divisible (fills the v6e/v7x 256-wide MXU);
    # full-dim (masked stores, no pad+slice round trip) when N%128 != 0.
    if N % 128 == 0:
        if N <= 512:
            tn = N
        elif N % 512 == 0:
            tn = 512
        elif N % 256 == 0:
            tn = 256
        else:
            tn = 128
    else:
        tn = N

    a_p = a if Mp == M else jnp.pad(a, ((0, Mp - M), (0, 0)))
    b_bf = b.astype(jnp.bfloat16)
    bias_f = bias.reshape(1, N).astype(jnp.float32)

    out = pl.pallas_call(
        functools.partial(_mm_bias_act_kernel, relu=relu),
        out_shape=jax.ShapeDtypeStruct((Mp, N), out_dtype),
        grid=(Mp // tm, N // tn),
        in_specs=[
            pl.BlockSpec((tm, K), lambda i, j: (i, 0)),
            pl.BlockSpec((K, tn), lambda i, j: (0, j)),
            pl.BlockSpec((1, tn), lambda i, j: (0, j)),
        ],
        out_specs=pl.BlockSpec((tm, tn), lambda i, j: (i, j)),
        compiler_params=pltpu.CompilerParams(
            dimension_semantics=("parallel", "parallel"),
            vmem_limit_bytes=_VMEM_LIMIT),
    )(a_p, b_bf, bias_f)
    if Mp != M:
        out = out[:M]
    return out


# ----------------------------------------------------------------------------
# Kernel 2: kxk conv (stride s) + BN + ReLU via in-kernel per-tap accumulation.
# The input arrives stride-decimated so every tap is a contiguous window; the
# k^2-inflated im2col patch matrix never touches HBM.
# ----------------------------------------------------------------------------
def _conv_taps_kernel(x_ref, w_ref, bias_ref, o_ref, *, taps, Ho, Wo, relu):
    cin = x_ref.shape[-1]
    cout = w_ref.shape[-1]
    acc = jnp.zeros((Ho * Wo, cout), jnp.float32)
    for t, (r0, c0) in enumerate(taps):
        patch = x_ref[0, pl.ds(r0, Ho), pl.ds(c0, Wo), :]     # (Ho, Wo, Cin)
        patch = patch.reshape(Ho * Wo, cin)
        acc = acc + jnp.dot(patch, w_ref[t], preferred_element_type=jnp.float32)
    acc = acc + bias_ref[...]
    if relu:
        acc = jnp.maximum(acc, 0.0)
    o_ref[0] = acc.astype(o_ref.dtype)


def pallas_conv_kxk_bn_relu(x, w, bn, *, stride, padding, out_dtype=jnp.bfloat16):
    """x: (B,H,W,Cin) NHWC; w: (Cout,Cin,k,k) PyTorch layout.
    Returns (B, Ho*Wo, Cout) with BN folded in and ReLU applied."""
    B, H, W, Cin = x.shape
    Cout, _, k, _ = w.shape
    s = stride
    Ho = (H + 2 * padding - k) // s + 1
    Wo = (W + 2 * padding - k) // s + 1
    Hd = Ho + (k - 1) // s
    Wd = Wo + (k - 1) // s

    scale, shift = bn_fold(bn)
    wm = (jnp.transpose(w, (2, 3, 1, 0)).reshape(k * k, Cin, Cout)
          * scale[None, None, :]).astype(jnp.bfloat16)
    bias = shift.reshape(1, Cout).astype(jnp.float32)

    # Stride-decimation: s*s sub-grids (total bytes == padded input), so tap (i,j)
    # becomes a plain contiguous (Ho,Wo) window of sub-grid (i%s, j%s).
    xp = jnp.pad(x, ((0, 0), (padding, padding), (padding, padding), (0, 0)))
    subs = []
    for p in range(s):
        for q in range(s):
            sub = xp[:, p::s, q::s, :][:, :Hd, :Wd, :]
            dh, dw = Hd - sub.shape[1], Wd - sub.shape[2]
            if dh or dw:
                sub = jnp.pad(sub, ((0, 0), (0, dh), (0, dw), (0, 0)))
            subs.append(sub)
    xdec = jnp.stack(subs, axis=1).reshape(B, s * s * Hd, Wd, Cin)

    taps = tuple((((i % s) * s + (j % s)) * Hd + i // s, j // s)
                 for i in range(k) for j in range(k))

    return pl.pallas_call(
        functools.partial(_conv_taps_kernel, taps=taps, Ho=Ho, Wo=Wo, relu=True),
        out_shape=jax.ShapeDtypeStruct((B, Ho * Wo, Cout), out_dtype),
        grid=(B,),
        in_specs=[
            pl.BlockSpec((1, s * s * Hd, Wd, Cin), lambda b: (b, 0, 0, 0)),
            pl.BlockSpec((k * k, Cin, Cout), lambda b: (0, 0, 0)),
            pl.BlockSpec((1, Cout), lambda b: (0, 0)),
        ],
        out_specs=pl.BlockSpec((1, Ho * Wo, Cout), lambda b: (b, 0, 0)),
        compiler_params=pltpu.CompilerParams(
            dimension_semantics=("parallel",),
            vmem_limit_bytes=_VMEM_LIMIT),
    )(xdec, wm, bias)


# ----------------------------------------------------------------------------
# Kernel 3: conv3 (1x1) + BN3 fused with SelfAtten partial statistics:
#   ch_stats = [sum, sumsq] over spatial per channel, sp_stats = [sum, sumsq]
#   over channels per pixel.  Avoids re-reading the (B,HW,C) tensor for mean/std.
# ----------------------------------------------------------------------------
def _conv1x1_stats_kernel(x_ref, w_ref, bias_ref, o_ref, ch_ref, sp_ref):
    out = jnp.dot(x_ref[0], w_ref[...],
                  preferred_element_type=jnp.float32) + bias_ref[...]
    o_ref[0] = out
    sq = out * out
    ch_ref[0] = jnp.concatenate(
        [jnp.sum(out, axis=0, keepdims=True),
         jnp.sum(sq, axis=0, keepdims=True)], axis=0)        # (2, C)
    sp_ref[0] = jnp.concatenate(
        [jnp.sum(out, axis=1, keepdims=True),
         jnp.sum(sq, axis=1, keepdims=True)], axis=1)        # (HW, 2)


def pallas_conv1x1_bn_stats(x, w, bn):
    """x: (B,HW,Cin) bf16; w: (Cout,Cin,1,1).
    Returns: out (B,HW,Cout) f32, ch_stats (B,2,Cout), sp_stats (B,HW,2)."""
    B, HW, Cin = x.shape
    Cout = w.shape[0]
    wm, shift = _fold_1x1(w, bn)
    wm = wm.astype(jnp.bfloat16)
    bias = shift.reshape(1, Cout).astype(jnp.float32)

    return pl.pallas_call(
        _conv1x1_stats_kernel,
        out_shape=(jax.ShapeDtypeStruct((B, HW, Cout), jnp.float32),
                   jax.ShapeDtypeStruct((B, 2, Cout), jnp.float32),
                   jax.ShapeDtypeStruct((B, HW, 2), jnp.float32)),
        grid=(B,),
        in_specs=[
            pl.BlockSpec((1, HW, Cin), lambda b: (b, 0, 0)),
            pl.BlockSpec((Cin, Cout), lambda b: (0, 0)),
            pl.BlockSpec((1, Cout), lambda b: (0, 0)),
        ],
        out_specs=(pl.BlockSpec((1, HW, Cout), lambda b: (b, 0, 0)),
                   pl.BlockSpec((1, 2, Cout), lambda b: (b, 0, 0)),
                   pl.BlockSpec((1, HW, 2), lambda b: (b, 0, 0))),
        compiler_params=pltpu.CompilerParams(
            dimension_semantics=("parallel",),
            vmem_limit_bytes=_VMEM_LIMIT),
    )(x, wm, bias)


# ----------------------------------------------------------------------------
# Kernel 4: fused attention-scale * out + residual + ReLU.
# scale_c is (B,1,C), scale_s is (B,HW,1): broadcast in-kernel, never (B,HW,C).
# ----------------------------------------------------------------------------
def _atten_residual_kernel(x_ref, sc_ref, ss_ref, id_ref, o_ref):
    # constants intentionally match the PyTorch SelfAtten literals exactly
    scale = 0.3333333 * sc_ref[...] + 0.666666 * ss_ref[...]
    o_ref[...] = jnp.maximum(x_ref[...] * scale + id_ref[...], 0.0)


def pallas_atten_residual_relu(x, scale_c, scale_s, identity):
    """x, identity: (B,HW,C) f32; scale_c: (B,C); scale_s: (B,HW).
    Returns relu(x * (0.3333333*scale_c + 0.666666*scale_s) + identity)."""
    B, HW, C = x.shape
    if HW <= 2048:
        t_hw, HWp = HW, HW
    else:
        t_hw = 512
        HWp = _round_up(HW, t_hw)
    if HWp != HW:
        x = jnp.pad(x, ((0, 0), (0, HWp - HW), (0, 0)))
        identity = jnp.pad(identity, ((0, 0), (0, HWp - HW), (0, 0)))
        scale_s = jnp.pad(scale_s, ((0, 0), (0, HWp - HW)))
    sc = scale_c.reshape(B, 1, C).astype(jnp.float32)
    ss = scale_s.reshape(B, HWp, 1).astype(jnp.float32)

    out = pl.pallas_call(
        _atten_residual_kernel,
        out_shape=jax.ShapeDtypeStruct((B, HWp, C), jnp.float32),
        grid=(B, HWp // t_hw),
        in_specs=[
            pl.BlockSpec((1, t_hw, C), lambda b, m: (b, m, 0)),
            pl.BlockSpec((1, 1, C), lambda b, m: (b, 0, 0)),
            pl.BlockSpec((1, t_hw, 1), lambda b, m: (b, m, 0)),
            pl.BlockSpec((1, t_hw, C), lambda b, m: (b, m, 0)),
        ],
        out_specs=pl.BlockSpec((1, t_hw, C), lambda b, m: (b, m, 0)),
        compiler_params=pltpu.CompilerParams(
            dimension_semantics=("parallel", "parallel"),
            vmem_limit_bytes=_VMEM_LIMIT),
    )(x, sc, ss, identity)
    if HWp != HW:
        out = out[:, :HW, :]
    return out


# ----------------------------------------------------------------------------
# SelfAtten gates from the fused partial statistics (tiny (B,C)/(B,H,W) tensors,
# plain JAX).  Unbiased variance derived from sum / sum-of-squares.
# ----------------------------------------------------------------------------
def self_atten_gates(ch_stats, sp_stats, H, W, p):
    B, _, C = ch_stats.shape
    HW = sp_stats.shape[1]

    # ChannelGate: mean/std over spatial -> Conv2d(1,1,(1,3)) over channels -> sigmoid
    c_sum, c_sq = ch_stats[:, 0, :], ch_stats[:, 1, :]
    mean_c = c_sum / HW
    var_c = jnp.maximum(c_sq - HW * mean_c * mean_c, 0.0) / (HW - 1)
    std_c = jnp.sqrt(var_c)
    wc = jax.nn.sigmoid(p["cg_weight"])
    outc = 0.5 * (mean_c + std_c) + wc[0] * mean_c + wc[1] * std_c
    kc = p["cg_conv"].reshape(3)
    op = jnp.pad(outc, ((0, 0), (1, 1)))
    outc = kc[0] * op[:, :-2] + kc[1] * op[:, 1:-1] + kc[2] * op[:, 2:]
    scale_c = jax.nn.sigmoid(outc)                           # (B, C)

    # SpatialGate: mean/std over channels -> 3x3 conv -> 3x3 avg-pool -> sigmoid
    s_sum, s_sq = sp_stats[..., 0], sp_stats[..., 1]
    mean_s = s_sum / C
    var_s = jnp.maximum(s_sq - C * mean_s * mean_s, 0.0) / (C - 1)
    std_s = jnp.sqrt(var_s)
    ws = jax.nn.sigmoid(p["sg_weight"])
    s2d = ((0.5 + ws[0]) * mean_s + (0.5 + ws[1]) * std_s).reshape(B, H, W)
    kk = p["sg_conv"].reshape(3, 3)
    sp = jnp.pad(s2d, ((0, 0), (1, 1), (1, 1)))
    conv = jnp.zeros_like(s2d)
    for i in range(3):
        for j in range(3):
            conv = conv + kk[i, j] * sp[:, i:i + H, j:j + W]
    cp = jnp.pad(conv, ((0, 0), (1, 1), (1, 1)))
    pooled = jnp.zeros_like(conv)
    for i in range(3):
        for j in range(3):
            pooled = pooled + cp[:, i:i + H, j:j + W]
    pooled = pooled / 9.0                  # AvgPool2d(3,1,1), count_include_pad=True
    scale_s = jax.nn.sigmoid(pooled).reshape(B, HW)
    return scale_c, scale_s


# ----------------------------------------------------------------------------
# Bottleneck forward (NCHW in / NCHW out, like the PyTorch module)
# ----------------------------------------------------------------------------
def bottleneck_forward(params, x_nchw):
    k = params["kernel_size"]
    s = params["stride"]
    pad = (k - 1) // 2                                       # dilation=1 paddings
    x = jnp.transpose(x_nchw, (0, 2, 3, 1)).astype(jnp.float32)    # NCHW -> NHWC
    B, H, W, Cin = x.shape

    # conv1 (1x1) + bn1 + relu -> bf16
    w1, b1 = _fold_1x1(params["conv1"], params["bn1"])
    out = pallas_matmul_bias_act(x.reshape(B * H * W, Cin), w1, b1,
                                 relu=True, out_dtype=jnp.bfloat16)
    width = out.shape[-1]
    out = out.reshape(B, H, W, width)

    # conv2 (kxk, stride) + bn2 + relu -> (B, Ho*Wo, width) bf16
    out = pallas_conv_kxk_bn_relu(out, params["conv2"], params["bn2"],
                                  stride=s, padding=pad)
    Ho = (H + 2 * pad - k) // s + 1
    Wo = (W + 2 * pad - k) // s + 1

    # conv3 (1x1) + bn3, fused with the SelfAtten partial statistics
    out, ch_stats, sp_stats = pallas_conv1x1_bn_stats(out, params["conv3"],
                                                      params["bn3"])
    C = out.shape[-1]

    scale_c, scale_s = self_atten_gates(ch_stats, sp_stats, Ho, Wo, params["att"])

    # identity path (optional downsample: 1x1 strided conv + BN, folded the same way)
    if params.get("down") is not None:
        wd, bd = _fold_1x1(params["down"]["conv"], params["down"]["bn"])
        a = x[:, ::s, ::s, :].reshape(B * Ho * Wo, Cin)
        identity = pallas_matmul_bias_act(a, wd, bd, relu=False,
                                          out_dtype=jnp.float32)
        identity = identity.reshape(B, Ho * Wo, C)
    else:
        identity = x.reshape(B, H * W, Cin)

    out = pallas_atten_residual_relu(out, scale_c, scale_s, identity)
    out = out.reshape(B, Ho, Wo, C)
    return jnp.transpose(out, (0, 3, 1, 2))                  # back to NCHW


# ----------------------------------------------------------------------------
# Deterministic parameter init (matches the PyTorch module's shapes)
# ----------------------------------------------------------------------------
class KeyGen:
    def __init__(self, key):
        self.key = key

    def __call__(self):
        self.key, sub = jax.random.split(self.key)
        return sub


def kaiming_conv(key, cout, cin, kh, kw):
    fan_out = cout * kh * kw
    std = math.sqrt(2.0 / fan_out)
    return std * jax.random.normal(key, (cout, cin, kh, kw), jnp.float32)


def make_bn(c):
    return {"gamma": jnp.ones((c,), jnp.float32), "beta": jnp.zeros((c,), jnp.float32),
            "mean": jnp.zeros((c,), jnp.float32), "var": jnp.ones((c,), jnp.float32)}


def init_bottleneck(key, kernel_size, inplanes, planes, stride):
    expansion = 4
    width = planes                                           # base_width=64, groups=1
    kg = KeyGen(key)
    p = {
        "kernel_size": kernel_size, "stride": stride,
        "conv1": kaiming_conv(kg(), width, inplanes, 1, 1), "bn1": make_bn(width),
        "conv2": kaiming_conv(kg(), width, width, kernel_size, kernel_size),
        "bn2": make_bn(width),
        "conv3": kaiming_conv(kg(), planes * expansion, width, 1, 1),
        "bn3": make_bn(planes * expansion),
        "att": {"cg_weight": jax.random.uniform(kg(), (2,), jnp.float32),
                "cg_conv": kaiming_conv(kg(), 1, 1, 1, 3),
                "sg_weight": jax.random.uniform(kg(), (2,), jnp.float32),
                "sg_conv": kaiming_conv(kg(), 1, 1, 3, 3)},
        "down": None,
    }
    if stride != 1 or inplanes != planes * expansion:
        p["down"] = {"conv": kaiming_conv(kg(), planes * expansion, inplanes, 1, 1),
                     "bn": make_bn(planes * expansion)}
    return p


# ----------------------------------------------------------------------------
if __name__ == "__main__":
    key = jax.random.PRNGKey(0)
    kp, kx = jax.random.split(key)

    # Bottleneck(kernel_size=3, inplanes=64, planes=32, stride=2) with downsample.
    params = init_bottleneck(kp, kernel_size=3, inplanes=64, planes=32, stride=2)
    x = jax.random.normal(kx, (2, 64, 16, 16), jnp.float32)      # NCHW like PyTorch

    fwd = jax.jit(lambda xx: bottleneck_forward(params, xx))
    out = jax.block_until_ready(fwd(x))

    assert out.shape == (2, 128, 8, 8), out.shape
    assert bool(jnp.all(jnp.isfinite(out)))
    print("KERNEL_OK")
</pallas_src>

<mosaic_0001>
module attributes {stable_mosaic.version = 11 : i64} {
  func.func @_mm_bias_act_kernel(%arg0: i32, %arg1: i32, %arg2: memref<256x64xf32, #tpu.memory_space<vmem>>, %arg3: memref<64x32xbf16, #tpu.memory_space<vmem>>, %arg4: memref<1x32xf32, #tpu.memory_space<vmem>>, %arg5: memref<256x32xbf16, #tpu.memory_space<vmem>>) attributes {dimension_semantics = [#tpu.dimension_semantics<parallel>, #tpu.dimension_semantics<parallel>], iteration_bounds = array<i64: 2, 1>, scalar_prefetch = 0 : i64, scratch_operands = 0 : i64, tpu.core_type = #tpu.core_type<tc>, window_params = [{transform_indices = @transform_0, window_bounds = array<i64: 256, 64>}, {transform_indices = @transform_1, window_bounds = array<i64: 64, 32>}, {transform_indices = @transform_2, window_bounds = array<i64: 1, 32>}, {transform_indices = @transform_3, window_bounds = array<i64: 256, 32>}]} {
    %c0 = arith.constant 0 : index
    %c0_0 = arith.constant 0 : index
    %0 = vector.load %arg2[%c0, %c0_0] : memref<256x64xf32, #tpu.memory_space<vmem>>, vector<256x64xf32>
    %1 = arith.truncf %0 : vector<256x64xf32> to vector<256x64xbf16>
    %c0_1 = arith.constant 0 : index
    %c0_2 = arith.constant 0 : index
    %2 = vector.load %arg3[%c0_1, %c0_2] : memref<64x32xbf16, #tpu.memory_space<vmem>>, vector<64x32xbf16>
    %cst = arith.constant dense<0.000000e+00> : vector<256x32xf32>
    %3 = tpu.matmul %1, %2, %cst {dimension_numbers = #tpu.dot_dimension_numbers<[1], [0], [0], [1], [0, 0, 1, 1], [], []>} : vector<256x64xbf16>, vector<64x32xbf16>, vector<256x32xf32> -> vector<256x32xf32>
    %c0_3 = arith.constant 0 : index
    %c0_4 = arith.constant 0 : index
    %4 = vector.load %arg4[%c0_3, %c0_4] : memref<1x32xf32, #tpu.memory_space<vmem>>, vector<1x32xf32>
    %5 = vector.broadcast %4 : vector<1x32xf32> to vector<256x32xf32>
    %6 = arith.addf %3, %5 : vector<256x32xf32>
    %cst_5 = arith.constant 0.000000e+00 : f32
    %7 = vector.broadcast %cst_5 : f32 to vector<256x32xf32>
    %8 = arith.maximumf %6, %7 : vector<256x32xf32>
    %9 = arith.truncf %8 : vector<256x32xf32> to vector<256x32xbf16>
    %c0_6 = arith.constant 0 : index
    %c0_7 = arith.constant 0 : index
    %10 = vector.load %arg5[%c0_6, %c0_7] : memref<256x32xbf16, #tpu.memory_space<vmem>>, vector<256x32xbf16>
    tpu.vector_store %arg5[%c0_6, %c0_7], %9 {strides = array<i32>} : memref<256x32xbf16, #tpu.memory_space<vmem>>, vector<256x32xbf16>,
    return
  }
  func.func @transform_0(%arg0: i32, %arg1: i32) -> (i32, i32) {
    %c0_i32 = arith.constant 0 : i32
    %c0_i32_0 = arith.constant 0 : i32
    return %arg0, %c0_i32 : i32, i32
  }
  func.func @transform_1(%arg0: i32, %arg1: i32) -> (i32, i32) {
    %c0_i32 = arith.constant 0 : i32
    %c0_i32_0 = arith.constant 0 : i32
    return %c0_i32, %arg1 : i32, i32
  }
  func.func @transform_2(%arg0: i32, %arg1: i32) -> (i32, i32) {
    %c0_i32 = arith.constant 0 : i32
    %c0_i32_0 = arith.constant 0 : i32
    return %c0_i32, %arg1 : i32, i32
  }
  func.func @transform_3(%arg0: i32, %arg1: i32) -> (i32, i32) {
    %c0_i32 = arith.constant 0 : i32
    return %arg0, %arg1 : i32, i32
  }
}

module attributes {stable_mosaic.version = 11 : i64} {
  func.func @_conv1x1_stats_kernel(%arg0: i32, %arg1: memref<1x64x32xbf16, #tpu.memory_space<vmem>>, %arg2: memref<32x128xbf16, #tpu.memory_space<vmem>>, %arg3: memref<1x128xf32, #tpu.memory_space<vmem>>, %arg4: memref<1x64x128xf32, #tpu.memory_space<vmem>>, %arg5: memref<1x2x128xf32, #tpu.memory_space<vmem>>, %arg6: memref<1x64x2xf32, #tpu.memory_space<vmem>>) attributes {dimension_semantics = [#tpu.dimension_semantics<parallel>], iteration_bounds = array<i64: 2>, scalar_prefetch = 0 : i64, scratch_operands = 0 : i64, tpu.core_type = #tpu.core_type<tc>, window_params = [{transform_indices = @transform_0, window_bounds = array<i64: 1, 64, 32>}, {pipeline_mode = #tpu.pipeline_mode<synchronous>, transform_indices = @transform_1, window_bounds = array<i64: 32, 128>}, {pipeline_mode = #tpu.pipeline_mode<synchronous>, transform_indices = @transform_2, window_bounds = array<i64: 1, 128>}, {transform_indices = @transform_3, window_bounds = array<i64: 1, 64, 128>}, {transform_indices = @transform_4, window_bounds = array<i64: 1, 2, 128>}, {transform_indices = @transform_5, window_bounds = array<i64: 1, 64, 2>}]} {
    %c0 = arith.constant 0 : index
    %c0_0 = arith.constant 0 : index
    %c0_1 = arith.constant 0 : index
    %0 = vector.load %arg1[%c0, %c0_0, %c0_1] : memref<1x64x32xbf16, #tpu.memory_space<vmem>>, vector<1x64x32xbf16>
    %1 = vector.shape_cast %0 : vector<1x64x32xbf16> to vector<64x32xbf16>
    %c0_2 = arith.constant 0 : index
    %c0_3 = arith.constant 0 : index
    %2 = vector.load %arg2[%c0_2, %c0_3] : memref<32x128xbf16, #tpu.memory_space<vmem>>, vector<32x128xbf16>
    %cst = arith.constant dense<0.000000e+00> : vector<64x128xf32>
    %3 = tpu.matmul %1, %2, %cst {dimension_numbers = #tpu.dot_dimension_numbers<[1], [0], [0], [1], [0, 0, 1, 1], [], []>} : vector<64x32xbf16>, vector<32x128xbf16>, vector<64x128xf32> -> vector<64x128xf32>
    %c0_4 = arith.constant 0 : index
    %c0_5 = arith.constant 0 : index
    %4 = vector.load %arg3[%c0_4, %c0_5] : memref<1x128xf32, #tpu.memory_space<vmem>>, vector<1x128xf32>
    %5 = vector.broadcast %4 : vector<1x128xf32> to vector<64x128xf32>
    %6 = arith.addf %3, %5 : vector<64x128xf32>
    %c0_6 = arith.constant 0 : index
    %c0_7 = arith.constant 0 : index
    %c0_8 = arith.constant 0 : index
    %7 = vector.load %arg4[%c0_6, %c0_7, %c0_8] : memref<1x64x128xf32, #tpu.memory_space<vmem>>, vector<1x64x128xf32>
    %8 = vector.shape_cast %7 : vector<1x64x128xf32> to vector<64x128xf32>
    %9 = vector.shape_cast %6 : vector<64x128xf32> to vector<1x64x128xf32>
    tpu.vector_store %arg4[%c0_6, %c0_7, %c0_8], %9 {strides = array<i32>} : memref<1x64x128xf32, #tpu.memory_space<vmem>>, vector<1x64x128xf32>,
    %10 = arith.mulf %6, %6 : vector<64x128xf32>
    %cst_9 = arith.constant dense<0.000000e+00> : vector<128xf32>
    %11 = vector.multi_reduction <add>, %6, %cst_9 [0] : vector<64x128xf32> to vector<128xf32>
    %12 = vector.shape_cast %11 : vector<128xf32> to vector<1x128xf32>
    %cst_10 = arith.constant dense<0.000000e+00> : vector<128xf32>
    %13 = vector.multi_reduction <add>, %10, %cst_10 [0] : vector<64x128xf32> to vector<128xf32>
    %14 = vector.shape_cast %13 : vector<128xf32> to vector<1x128xf32>
    %15 = tpu.concatenate %12, %14 in 0 : vector<1x128xf32>, vector<1x128xf32> -> vector<2x128xf32>
    %c0_11 = arith.constant 0 : index
    %c0_12 = arith.constant 0 : index
    %c0_13 = arith.constant 0 : index
    %16 = vector.load %arg5[%c0_11, %c0_12, %c0_13] : memref<1x2x128xf32, #tpu.memory_space<vmem>>, vector<1x2x128xf32>
    %17 = vector.shape_cast %16 : vector<1x2x128xf32> to vector<2x128xf32>
    %18 = vector.shape_cast %15 : vector<2x128xf32> to vector<1x2x128xf32>
    tpu.vector_store %arg5[%c0_11, %c0_12, %c0_13], %18 {strides = array<i32>} : memref<1x2x128xf32, #tpu.memory_space<vmem>>, vector<1x2x128xf32>,
    %cst_14 = arith.constant dense<0.000000e+00> : vector<64xf32>
    %19 = vector.multi_reduction <add>, %6, %cst_14 [1] : vector<64x128xf32> to vector<64xf32>
    %20 = vector.shape_cast %19 : vector<64xf32> to vector<64x1xf32>
    %cst_15 = arith.constant dense<0.000000e+00> : vector<64xf32>
    %21 = vector.multi_reduction <add>, %10, %cst_15 [1] : vector<64x128xf32> to vector<64xf32>
    %22 = vector.shape_cast %21 : vector<64xf32> to vector<64x1xf32>
    %23 = tpu.concatenate %20, %22 in 1 : vector<64x1xf32>, vector<64x1xf32> -> vector<64x2xf32>
    %c0_16 = arith.constant 0 : index
    %c0_17 = arith.constant 0 : index
    %c0_18 = arith.constant 0 : index
    %24 = vector.load %arg6[%c0_16, %c0_17, %c0_18] : memref<1x64x2xf32, #tpu.memory_space<vmem>>, vector<1x64x2xf32>
    %25 = vector.shape_cast %24 : vector<1x64x2xf32> to vector<64x2xf32>
    %26 = vector.shape_cast %23 : vector<64x2xf32> to vector<1x64x2xf32>
    tpu.vector_store %arg6[%c0_16, %c0_17, %c0_18], %26 {strides = array<i32>} : memref<1x64x2xf32, #tpu.memory_space<vmem>>, vector<1x64x2xf32>,
    return
  }
  func.func @transform_0(%arg0: i32) -> (i32, i32, i32) {
    %c0_i32 = arith.constant 0 : i32
    %c0_i32_0 = arith.constant 0 : i32
    %c0_i32_1 = arith.constant 0 : i32
    return %arg0, %c0_i32, %c0_i32_0 : i32, i32, i32
  }
  func.func @transform_1(%arg0: i32) -> (i32, i32) {
    %c0_i32 = arith.constant 0 : i32
    %c0_i32_0 = arith.constant 0 : i32
    %c0_i32_1 = arith.constant 0 : i32
    return %c0_i32, %c0_i32_0 : i32, i32
  }
  func.func @transform_2(%arg0: i32) -> (i32, i32) {
    %c0_i32 = arith.constant 0 : i32
    %c0_i32_0 = arith.constant 0 : i32
    %c0_i32_1 = arith.constant 0 : i32
    return %c0_i32, %c0_i32_0 : i32, i32
  }
  func.func @transform_3(%arg0: i32) -> (i32, i32, i32) {
    %c0_i32 = arith.constant 0 : i32
    %c0_i32_0 = arith.constant 0 : i32
    %c0_i32_1 = arith.constant 0 : i32
    return %arg0, %c0_i32, %c0_i32_0 : i32, i32, i32
  }
  func.func @transform_4(%arg0: i32) -> (i32, i32, i32) {
    %c0_i32 = arith.constant 0 : i32
    %c0_i32_0 = arith.constant 0 : i32
    %c0_i32_1 = arith.constant 0 : i32
    return %arg0, %c0_i32, %c0_i32_0 : i32, i32, i32
  }
  func.func @transform_5(%arg0: i32) -> (i32, i32, i32) {
    %c0_i32 = arith.constant 0 : i32
    %c0_i32_0 = arith.constant 0 : i32
    %c0_i32_1 = arith.constant 0 : i32
    return %arg0, %c0_i32, %c0_i32_0 : i32, i32, i32
  }
}

module attributes {stable_mosaic.version = 11 : i64} {
  func.func @_conv_taps_kernel(%arg0: i32, %arg1: memref<1x36x9x32xbf16, #tpu.memory_space<vmem>>, %arg2: memref<9x32x32xbf16, #tpu.memory_space<vmem>>, %arg3: memref<1x32xf32, #tpu.memory_space<vmem>>, %arg4: memref<1x64x32xbf16, #tpu.memory_space<vmem>>) attributes {dimension_semantics = [#tpu.dimension_semantics<parallel>], iteration_bounds = array<i64: 2>, scalar_prefetch = 0 : i64, scratch_operands = 0 : i64, tpu.core_type = #tpu.core_type<tc>, window_params = [{transform_indices = @transform_0, window_bounds = array<i64: 1, 36, 9, 32>}, {pipeline_mode = #tpu.pipeline_mode<synchronous>, transform_indices = @transform_1, window_bounds = array<i64: 9, 32, 32>}, {pipeline_mode = #tpu.pipeline_mode<synchronous>, transform_indices = @transform_2, window_bounds = array<i64: 1, 32>}, {transform_indices = @transform_3, window_bounds = array<i64: 1, 64, 32>}]} {
    %cst = arith.constant 0.000000e+00 : f32
    %0 = vector.broadcast %cst : f32 to vector<64x32xf32>
    %c0 = arith.constant 0 : index
    %c0_0 = arith.constant 0 : index
    %c0_1 = arith.constant 0 : index
    %c0_2 = arith.constant 0 : index
    %1 = vector.load %arg1[%c0, %c0_0, %c0_1, %c0_2] : memref<1x36x9x32xbf16, #tpu.memory_space<vmem>>, vector<1x8x8x32xbf16>
    %2 = vector.shape_cast %1 : vector<1x8x8x32xbf16> to vector<8x8x32xbf16>
    %3 = vector.shape_cast %2 : vector<8x8x32xbf16> to vector<64x32xbf16>
    %c0_3 = arith.constant 0 : index
    %c0_4 = arith.constant 0 : index
    %c0_5 = arith.constant 0 : index
    %4 = vector.load %arg2[%c0_3, %c0_4, %c0_5] : memref<9x32x32xbf16, #tpu.memory_space<vmem>>, vector<1x32x32xbf16>
    %5 = vector.shape_cast %4 : vector<1x32x32xbf16> to vector<32x32xbf16>
    %cst_6 = arith.constant dense<0.000000e+00> : vector<64x32xf32>
    %6 = tpu.matmul %3, %5, %cst_6 {dimension_numbers = #tpu.dot_dimension_numbers<[1], [0], [0], [1], [0, 0, 1, 1], [], []>} : vector<64x32xbf16>, vector<32x32xbf16>, vector<64x32xf32> -> vector<64x32xf32>
    %7 = arith.addf %0, %6 : vector<64x32xf32>
    %c0_7 = arith.constant 0 : index
    %c9 = arith.constant 9 : index
    %c0_8 = arith.constant 0 : index
    %c0_9 = arith.constant 0 : index
    %8 = vector.load %arg1[%c0_7, %c9, %c0_8, %c0_9] : memref<1x36x9x32xbf16, #tpu.memory_space<vmem>>, vector<1x8x8x32xbf16>
    %9 = vector.shape_cast %8 : vector<1x8x8x32xbf16> to vector<8x8x32xbf16>
    %10 = vector.shape_cast %9 : vector<8x8x32xbf16> to vector<64x32xbf16>
    %c1 = arith.constant 1 : index
    %c0_10 = arith.constant 0 : index
    %c0_11 = arith.constant 0 : index
    %11 = vector.load %arg2[%c1, %c0_10, %c0_11] : memref<9x32x32xbf16, #tpu.memory_space<vmem>>, vector<1x32x32xbf16>
    %12 = vector.shape_cast %11 : vector<1x32x32xbf16> to vector<32x32xbf16>
    %cst_12 = arith.constant dense<0.000000e+00> : vector<64x32xf32>
    %13 = tpu.matmul %10, %12, %cst_12 {dimension_numbers = #tpu.dot_dimension_numbers<[1], [0], [0], [1], [0, 0, 1, 1], [], []>} : vector<64x32xbf16>, vector<32x32xbf16>, vector<64x32xf32> -> vector<64x32xf32>
    %14 = arith.addf %7, %13 : vector<64x32xf32>
    %c0_13 = arith.constant 0 : index
    %c0_14 = arith.constant 0 : index
    %c1_15 = arith.constant 1 : index
    %c0_16 = arith.constant 0 : index
    %15 = vector.load %arg1[%c0_13, %c0_14, %c1_15, %c0_16] : memref<1x36x9x32xbf16, #tpu.memory_space<vmem>>, vector<1x8x8x32xbf16>
    %16 = vector.shape_cast %15 : vector<1x8x8x32xbf16> to vector<8x8x32xbf16>
    %17 = vector.shape_cast %16 : vector<8x8x32xbf16> to vector<64x32xbf16>
    %c2 = arith.constant 2 : index
    %c0_17 = arith.constant 0 : index
    %c0_18 = arith.constant 0 : index
    %18 = vector.load %arg2[%c2, %c0_17, %c0_18] : memref<9x32x32xbf16, #tpu.memory_space<vmem>>, vector<1x32x32xbf16>
    %19 = vector.shape_cast %18 : vector<1x32x32xbf16> to vector<32x32xbf16>
    %cst_19 = arith.constant dense<0.000000e+00> : vector<64x32xf32>
    %20 = tpu.matmul %17, %19, %cst_19 {dimension_numbers = #tpu.dot_dimension_numbers<[1], [0], [0], [1], [0, 0, 1, 1], [], []>} : vector<64x32xbf16>, vector<32x32xbf16>, vector<64x32xf32> -> vector<64x32xf32>
    %21 = arith.addf %14, %20 : vector<64x32xf32>
    %c0_20 = arith.constant 0 : index
    %c18 = arith.constant 18 : index
    %c0_21 = arith.constant 0 : index
    %c0_22 = arith.constant 0 : index
    %22 = vector.load %arg1[%c0_20, %c18, %c0_21, %c0_22] : memref<1x36x9x32xbf16, #tpu.memory_space<vmem>>, vector<1x8x8x32xbf16>
    %23 = vector.shape_cast %22 : vector<1x8x8x32xbf16> to vector<8x8x32xbf16>
    %24 = vector.shape_cast %23 : vector<8x8x32xbf16> to vector<64x32xbf16>
    %c3 = arith.constant 3 : index
    %c0_23 = arith.constant 0 : index
    %c0_24 = arith.constant 0 : index
    %25 = vector.load %arg2[%c3, %c0_23, %c0_24] : memref<9x32x32xbf16, #tpu.memory_space<vmem>>, vector<1x32x32xbf16>
    %26 = vector.shape_cast %25 : vector<1x32x32xbf16> to vector<32x32xbf16>
    %cst_25 = arith.constant dense<0.000000e+00> : vector<64x32xf32>
    %27 = tpu.matmul %24, %26, %cst_25 {dimension_numbers = #tpu.dot_dimension_numbers<[1], [0], [0], [1], [0, 0, 1, 1], [], []>} : vector<64x32xbf16>, vector<32x32xbf16>, vector<64x32xf32> -> vector<64x32xf32>
    %28 = arith.addf %21, %27 : vector<64x32xf32>
    %c0_26 = arith.constant 0 : index
    %c27 = arith.constant 27 : index
    %c0_27 = arith.constant 0 : index
    %c0_28 = arith.constant 0 : index
    %29 = vector.load %arg1[%c0_26, %c27, %c0_27, %c0_28] : memref<1x36x9x32xbf16, #tpu.memory_space<vmem>>, vector<1x8x8x32xbf16>
    %30 = vector.shape_cast %29 : vector<1x8x8x32xbf16> to vector<8x8x32xbf16>
    %31 = vector.shape_cast %30 : vector<8x8x32xbf16> to vector<64x32xbf16>
    %c4 = arith.constant 4 : index
    %c0_29 = arith.constant 0 : index
    %c0_30 = arith.constant 0 : index
    %32 = vector.load %arg2[%c4, %c0_29, %c0_30] : memref<9x32x32xbf16, #tpu.memory_space<vmem>>, vector<1x32x32xbf16>
    %33 = vector.shape_cast %32 : vector<1x32x32xbf16> to vector<32x32xbf16>
    %cst_31 = arith.constant dense<0.000000e+00> : vector<64x32xf32>
    %34 = tpu.matmul %31, %33, %cst_31 {dimension_numbers = #tpu.dot_dimension_numbers<[1], [0], [0], [1], [0, 0, 1, 1], [], []>} : vector<64x32xbf16>, vector<32x32xbf16>, vector<64x32xf32> -> vector<64x32xf32>
    %35 = arith.addf %28, %34 : vector<64x32xf32>
    %c0_32 = arith.constant 0 : index
    %c18_33 = arith.constant 18 : index
    %c1_34 = arith.constant 1 : index
    %c0_35 = arith.constant 0 : index
    %36 = vector.load %arg1[%c0_32, %c18_33, %c1_34, %c0_35] : memref<1x36x9x32xbf16, #tpu.memory_space<vmem>>, vector<1x8x8x32xbf16>
    %37 = vector.shape_cast %36 : vector<1x8x8x32xbf16> to vector<8x8x32xbf16>
    %38 = vector.shape_cast %37 : vector<8x8x32xbf16> to vector<64x32xbf16>
    %c5 = arith.constant 5 : index
    %c0_36 = arith.constant 0 : index
    %c0_37 = arith.constant 0 : index
    %39 = vector.load %arg2[%c5, %c0_36, %c0_37] : memref<9x32x32xbf16, #tpu.memory_space<vmem>>, vector<1x32x32xbf16>
    %40 = vector.shape_cast %39 : vector<1x32x32xbf16> to vector<32x32xbf16>
    %cst_38 = arith.constant dense<0.000000e+00> : vector<64x32xf32>
    %41 = tpu.matmul %38, %40, %cst_38 {dimension_numbers = #tpu.dot_dimension_numbers<[1], [0], [0], [1], [0, 0, 1, 1], [], []>} : vector<64x32xbf16>, vector<32x32xbf16>, vector<64x32xf32> -> vector<64x32xf32>
    %42 = arith.addf %35, %41 : vector<64x32xf32>
    %c0_39 = arith.constant 0 : index
    %c1_40 = arith.constant 1 : index
    %c0_41 = arith.constant 0 : index
    %c0_42 = arith.constant 0 : index
    %43 = vector.load %arg1[%c0_39, %c1_40, %c0_41, %c0_42] : memref<1x36x9x32xbf16, #tpu.memory_space<vmem>>, vector<1x8x8x32xbf16>
    %44 = vector.shape_cast %43 : vector<1x8x8x32xbf16> to vector<8x8x32xbf16>
    %45 = vector.shape_cast %44 : vector<8x8x32xbf16> to vector<64x32xbf16>
    %c6 = arith.constant 6 : index
    %c0_43 = arith.constant 0 : index
    %c0_44 = arith.constant 0 : index
    %46 = vector.load %arg2[%c6, %c0_43, %c0_44] : memref<9x32x32xbf16, #tpu.memory_space<vmem>>, vector<1x32x32xbf16>
    %47 = vector.shape_cast %46 : vector<1x32x32xbf16> to vector<32x32xbf16>
    %cst_45 = arith.constant dense<0.000000e+00> : vector<64x32xf32>
    %48 = tpu.matmul %45, %47, %cst_45 {dimension_numbers = #tpu.dot_dimension_numbers<[1], [0], [0], [1], [0, 0, 1, 1], [], []>} : vector<64x32xbf16>, vector<32x32xbf16>, vector<64x32xf32> -> vector<64x32xf32>
    %49 = arith.addf %42, %48 : vector<64x32xf32>
    %c0_46 = arith.constant 0 : index
    %c10 = arith.constant 10 : index
    %c0_47 = arith.constant 0 : index
    %c0_48 = arith.constant 0 : index
    %50 = vector.load %arg1[%c0_46, %c10, %c0_47, %c0_48] : memref<1x36x9x32xbf16, #tpu.memory_space<vmem>>, vector<1x8x8x32xbf16>
    %51 = vector.shape_cast %50 : vector<1x8x8x32xbf16> to vector<8x8x32xbf16>
    %52 = vector.shape_cast %51 : vector<8x8x32xbf16> to vector<64x32xbf16>
    %c7 = arith.constant 7 : index
    %c0_49 = arith.constant 0 : index
    %c0_50 = arith.constant 0 : index
    %53 = vector.load %arg2[%c7, %c0_49, %c0_50] : memref<9x32x32xbf16, #tpu.memory_space<vmem>>, vector<1x32x32xbf16>
    %54 = vector.shape_cast %53 : vector<1x32x32xbf16> to vector<32x32xbf16>
    %cst_51 = arith.constant dense<0.000000e+00> : vector<64x32xf32>
    %55 = tpu.matmul %52, %54, %cst_51 {dimension_numbers = #tpu.dot_dimension_numbers<[1], [0], [0], [1], [0, 0, 1, 1], [], []>} : vector<64x32xbf16>, vector<32x32xbf16>, vector<64x32xf32> -> vector<64x32xf32>
    %56 = arith.addf %49, %55 : vector<64x32xf32>
    %c0_52 = arith.constant 0 : index
    %c1_53 = arith.constant 1 : index
    %c1_54 = arith.constant 1 : index
    %c0_55 = arith.constant 0 : index
    %57 = vector.load %arg1[%c0_52, %c1_53, %c1_54, %c0_55] : memref<1x36x9x32xbf16, #tpu.memory_space<vmem>>, vector<1x8x8x32xbf16>
    %58 = vector.shape_cast %57 : vector<1x8x8x32xbf16> to vector<8x8x32xbf16>
    %59 = vector.shape_cast %58 : vector<8x8x32xbf16> to vector<64x32xbf16>
    %c8 = arith.constant 8 : index
    %c0_56 = arith.constant 0 : index
    %c0_57 = arith.constant 0 : index
    %60 = vector.load %arg2[%c8, %c0_56, %c0_57] : memref<9x32x32xbf16, #tpu.memory_space<vmem>>, vector<1x32x32xbf16>
    %61 = vector.shape_cast %60 : vector<1x32x32xbf16> to vector<32x32xbf16>
    %cst_58 = arith.constant dense<0.000000e+00> : vector<64x32xf32>
    %62 = tpu.matmul %59, %61, %cst_58 {dimension_numbers = #tpu.dot_dimension_numbers<[1], [0], [0], [1], [0, 0, 1, 1], [], []>} : vector<64x32xbf16>, vector<32x32xbf16>, vector<64x32xf32> -> vector<64x32xf32>
    %63 = arith.addf %56, %62 : vector<64x32xf32>
    %c0_59 = arith.constant 0 : index
    %c0_60 = arith.constant 0 : index
    %64 = vector.load %arg3[%c0_59, %c0_60] : memref<1x32xf32, #tpu.memory_space<vmem>>, vector<1x32xf32>
    %65 = vector.broadcast %64 : vector<1x32xf32> to vector<64x32xf32>
    %66 = arith.addf %63, %65 : vector<64x32xf32>
    %cst_61 = arith.constant 0.000000e+00 : f32
    %67 = vector.broadcast %cst_61 : f32 to vector<64x32xf32>
    %68 = arith.maximumf %66, %67 : vector<64x32xf32>
    %69 = arith.truncf %68 : vector<64x32xf32> to vector<64x32xbf16>
    %c0_62 = arith.constant 0 : index
    %c0_63 = arith.constant 0 : index
    %c0_64 = arith.constant 0 : index
    %70 = vector.load %arg4[%c0_62, %c0_63, %c0_64] : memref<1x64x32xbf16, #tpu.memory_space<vmem>>, vector<1x64x32xbf16>
    %71 = vector.shape_cast %70 : vector<1x64x32xbf16> to vector<64x32xbf16>
    %72 = vector.shape_cast %69 : vector<64x32xbf16> to vector<1x64x32xbf16>
    tpu.vector_store %arg4[%c0_62, %c0_63, %c0_64], %72 {strides = array<i32>} : memref<1x64x32xbf16, #tpu.memory_space<vmem>>, vector<1x64x32xbf16>,
    return
  }
  func.func @transform_0(%arg0: i32) -> (i32, i32, i32, i32) {
    %c0_i32 = arith.constant 0 : i32
    %c0_i32_0 = arith.constant 0 : i32
    %c0_i32_1 = arith.constant 0 : i32
    %c0_i32_2 = arith.constant 0 : i32
    return %arg0, %c0_i32, %c0_i32_0, %c0_i32_1 : i32, i32, i32, i32
  }
  func.func @transform_1(%arg0: i32) -> (i32, i32, i32) {
    %c0_i32 = arith.constant 0 : i32
    %c0_i32_0 = arith.constant 0 : i32
    %c0_i32_1 = arith.constant 0 : i32
    %c0_i32_2 = arith.constant 0 : i32
    return %c0_i32, %c0_i32_0, %c0_i32_1 : i32, i32, i32
  }
  func.func @transform_2(%arg0: i32) -> (i32, i32) {
    %c0_i32 = arith.constant 0 : i32
    %c0_i32_0 = arith.constant 0 : i32
    %c0_i32_1 = arith.constant 0 : i32
    return %c0_i32, %c0_i32_0 : i32, i32
  }
  func.func @transform_3(%arg0: i32) -> (i32, i32, i32) {
    %c0_i32 = arith.constant 0 : i32
    %c0_i32_0 = arith.constant 0 : i32
    %c0_i32_1 = arith.constant 0 : i32
    return %arg0, %c0_i32, %c0_i32_0 : i32, i32, i32
  }
}

module attributes {stable_mosaic.version = 11 : i64} {
  func.func @_atten_residual_kernel(%arg0: i32, %arg1: i32, %arg2: memref<1x64x128xf32, #tpu.memory_space<vmem>>, %arg3: memref<1x1x128xf32, #tpu.memory_space<vmem>>, %arg4: memref<1x64x1xf32, #tpu.memory_space<vmem>>, %arg5: memref<1x64x128xf32, #tpu.memory_space<vmem>>, %arg6: memref<1x64x128xf32, #tpu.memory_space<vmem>>) attributes {dimension_semantics = [#tpu.dimension_semantics<parallel>, #tpu.dimension_semantics<parallel>], iteration_bounds = array<i64: 2, 1>, scalar_prefetch = 0 : i64, scratch_operands = 0 : i64, tpu.core_type = #tpu.core_type<tc>, window_params = [{transform_indices = @transform_0, window_bounds = array<i64: 1, 64, 128>}, {transform_indices = @transform_1, window_bounds = array<i64: 1, 1, 128>}, {transform_indices = @transform_2, window_bounds = array<i64: 1, 64, 1>}, {transform_indices = @transform_3, window_bounds = array<i64: 1, 64, 128>}, {transform_indices = @transform_4, window_bounds = array<i64: 1, 64, 128>}]} {
    %c0 = arith.constant 0 : index
    %c0_0 = arith.constant 0 : index
    %c0_1 = arith.constant 0 : index
    %0 = vector.load %arg3[%c0, %c0_0, %c0_1] : memref<1x1x128xf32, #tpu.memory_space<vmem>>, vector<1x1x128xf32>
    %cst = arith.constant 0.333333313 : f32
    %1 = vector.broadcast %cst : f32 to vector<1x1x128xf32>
    %2 = arith.mulf %1, %0 : vector<1x1x128xf32>
    %c0_2 = arith.constant 0 : index
    %c0_3 = arith.constant 0 : index
    %c0_4 = arith.constant 0 : index
    %3 = vector.load %arg4[%c0_2, %c0_3, %c0_4] : memref<1x64x1xf32, #tpu.memory_space<vmem>>, vector<1x64x1xf32>
    %cst_5 = arith.constant 0.666665971 : f32
    %4 = vector.broadcast %cst_5 : f32 to vector<1x64x1xf32>
    %5 = arith.mulf %4, %3 : vector<1x64x1xf32>
    %6 = vector.broadcast %2 : vector<1x1x128xf32> to vector<1x64x128xf32>
    %7 = vector.broadcast %5 : vector<1x64x1xf32> to vector<1x64x128xf32>
    %8 = arith.addf %6, %7 : vector<1x64x128xf32>
    %c0_6 = arith.constant 0 : index
    %c0_7 = arith.constant 0 : index
    %c0_8 = arith.constant 0 : index
    %9 = vector.load %arg2[%c0_6, %c0_7, %c0_8] : memref<1x64x128xf32, #tpu.memory_space<vmem>>, vector<1x64x128xf32>
    %10 = arith.mulf %9, %8 : vector<1x64x128xf32>
    %c0_9 = arith.constant 0 : index
    %c0_10 = arith.constant 0 : index
    %c0_11 = arith.constant 0 : index
    %11 = vector.load %arg5[%c0_9, %c0_10, %c0_11] : memref<1x64x128xf32, #tpu.memory_space<vmem>>, vector<1x64x128xf32>
    %12 = arith.addf %10, %11 : vector<1x64x128xf32>
    %cst_12 = arith.constant 0.000000e+00 : f32
    %13 = vector.broadcast %cst_12 : f32 to vector<1x64x128xf32>
    %14 = arith.maximumf %12, %13 : vector<1x64x128xf32>
    %c0_13 = arith.constant 0 : index
    %c0_14 = arith.constant 0 : index
    %c0_15 = arith.constant 0 : index
    %15 = vector.load %arg6[%c0_13, %c0_14, %c0_15] : memref<1x64x128xf32, #tpu.memory_space<vmem>>, vector<1x64x128xf32>
    tpu.vector_store %arg6[%c0_13, %c0_14, %c0_15], %14 {strides = array<i32>} : memref<1x64x128xf32, #tpu.memory_space<vmem>>, vector<1x64x128xf32>,
    return
  }
  func.func @transform_0(%arg0: i32, %arg1: i32) -> (i32, i32, i32) {
    %c0_i32 = arith.constant 0 : i32
    %c0_i32_0 = arith.constant 0 : i32
    return %arg0, %arg1, %c0_i32 : i32, i32, i32
  }
  func.func @transform_1(%arg0: i32, %arg1: i32) -> (i32, i32, i32) {
    %c0_i32 = arith.constant 0 : i32
    %c0_i32_0 = arith.constant 0 : i32
    %c0_i32_1 = arith.constant 0 : i32
    return %arg0, %c0_i32, %c0_i32_0 : i32, i32, i32
  }
  func.func @transform_2(%arg0: i32, %arg1: i32) -> (i32, i32, i32) {
    %c0_i32 = arith.constant 0 : i32
    %c0_i32_0 = arith.constant 0 : i32
    return %arg0, %arg1, %c0_i32 : i32, i32, i32
  }
  func.func @transform_3(%arg0: i32, %arg1: i32) -> (i32, i32, i32) {
    %c0_i32 = arith.constant 0 : i32
    %c0_i32_0 = arith.constant 0 : i32
    return %arg0, %arg1, %c0_i32 : i32, i32, i32
  }
  func.func @transform_4(%arg0: i32, %arg1: i32) -> (i32, i32, i32) {
    %c0_i32 = arith.constant 0 : i32
    %c0_i32_0 = arith.constant 0 : i32
    return %arg0, %arg1, %c0_i32 : i32, i32, i32
  }
}

module attributes {stable_mosaic.version = 11 : i64} {
  func.func @_mm_bias_act_kernel(%arg0: i32, %arg1: i32, %arg2: memref<64x64xf32, #tpu.memory_space<vmem>>, %arg3: memref<64x128xbf16, #tpu.memory_space<vmem>>, %arg4: memref<1x128xf32, #tpu.memory_space<vmem>>, %arg5: memref<64x128xf32, #tpu.memory_space<vmem>>) attributes {dimension_semantics = [#tpu.dimension_semantics<parallel>, #tpu.dimension_semantics<parallel>], iteration_bounds = array<i64: 2, 1>, scalar_prefetch = 0 : i64, scratch_operands = 0 : i64, tpu.core_type = #tpu.core_type<tc>, window_params = [{transform_indices = @transform_0, window_bounds = array<i64: 64, 64>}, {transform_indices = @transform_1, window_bounds = array<i64: 64, 128>}, {transform_indices = @transform_2, window_bounds = array<i64: 1, 128>}, {transform_indices = @transform_3, window_bounds = array<i64: 64, 128>}]} {
    %c0 = arith.constant 0 : index
    %c0_0 = arith.constant 0 : index
    %0 = vector.load %arg2[%c0, %c0_0] : memref<64x64xf32, #tpu.memory_space<vmem>>, vector<64x64xf32>
    %1 = arith.truncf %0 : vector<64x64xf32> to vector<64x64xbf16>
    %c0_1 = arith.constant 0 : index
    %c0_2 = arith.constant 0 : index
    %2 = vector.load %arg3[%c0_1, %c0_2] : memref<64x128xbf16, #tpu.memory_space<vmem>>, vector<64x128xbf16>
    %cst = arith.constant dense<0.000000e+00> : vector<64x128xf32>
    %3 = tpu.matmul %1, %2, %cst {dimension_numbers = #tpu.dot_dimension_numbers<[1], [0], [0], [1], [0, 0, 1, 1], [], []>} : vector<64x64xbf16>, vector<64x128xbf16>, vector<64x128xf32> -> vector<64x128xf32>
    %c0_3 = arith.constant 0 : index
    %c0_4 = arith.constant 0 : index
    %4 = vector.load %arg4[%c0_3, %c0_4] : memref<1x128xf32, #tpu.memory_space<vmem>>, vector<1x128xf32>
    %5 = vector.broadcast %4 : vector<1x128xf32> to vector<64x128xf32>
    %6 = arith.addf %3, %5 : vector<64x128xf32>
    %c0_5 = arith.constant 0 : index
    %c0_6 = arith.constant 0 : index
    %7 = vector.load %arg5[%c0_5, %c0_6] : memref<64x128xf32, #tpu.memory_space<vmem>>, vector<64x128xf32>
    tpu.vector_store %arg5[%c0_5, %c0_6], %6 {strides = array<i32>} : memref<64x128xf32, #tpu.memory_space<vmem>>, vector<64x128xf32>,
    return
  }
  func.func @transform_0(%arg0: i32, %arg1: i32) -> (i32, i32) {
    %c0_i32 = arith.constant 0 : i32
    %c0_i32_0 = arith.constant 0 : i32
    return %arg0, %c0_i32 : i32, i32
  }
  func.func @transform_1(%arg0: i32, %arg1: i32) -> (i32, i32) {
    %c0_i32 = arith.constant 0 : i32
    %c0_i32_0 = arith.constant 0 : i32
    return %c0_i32, %arg1 : i32, i32
  }
  func.func @transform_2(%arg0: i32, %arg1: i32) -> (i32, i32) {
    %c0_i32 = arith.constant 0 : i32
    %c0_i32_0 = arith.constant 0 : i32
    return %c0_i32, %arg1 : i32, i32
  }
  func.func @transform_3(%arg0: i32, %arg1: i32) -> (i32, i32) {
    %c0_i32 = arith.constant 0 : i32
    return %arg0, %arg1 : i32, i32
  }
}

</mosaic_0001>

<bundles_post_ra>
// kernel: _lambda_.5
= control target key start
LH: loop header
LB: loop body
LE: loop exit
PB: predicated region body
PF: predicated region fallthrough
CT: control target
= control target key end

     0   :  { %8 = vsyncpa [#allocation3], 0  ;;  %s1503_s0 = inlined_call_operand.hbm [shape: f32[512,64], index: 0, kind: input, shape index: {}]   ;;  %s1504_s1 = inlined_call_operand.hbm [shape: bf16[64,32], index: 1, kind: input, shape index: {}]   ;;  %s1505_s2 = inlined_call_operand.vmem [shape: f32[1,32], index: 2, kind: input, shape index: {}]   ;;  %s1506_s3 = inlined_call_operand.vmem [shape: bf16[512,32], index: 3, kind: output, shape index: {}]  }
   0x1   :  { %10 = vsyncpa [#allocation3 + $0x1], 0 }
   0x2   :  { %11 = vsyncpa [#allocation5], 0  ;;  %s1230_s12 = smov 0   ;;  %s1232_s13 = smov 0  }
   0x3   :  { %s1234_s14 = smov 0   ;;  %s1236_s15 = smov 0  }
   0x4   :  { %s1238_s16 = smov 0   ;;  %s1240_s17 = smov 0  }
   0x5 LB: > { %s850_s18 = sadd.s32 4294967295, %s1202_s17   ;;  %p49_p0 = scmp.ne.s32.totalorder %s1186_s13, %s1182_s12  ;;  %s1202_s17 = sphi %s1240_s17, %s17_s17   ;;  %s1198_s16 = sphi %s1238_s16, %s1516_s16   ;;  %s1194_s15 = sphi %s1236_s15, %s1515_s15   ;;  %s1190_s14 = sphi %s1234_s14, %s1514_s14   ;;  %s1186_s13 = sphi %s1232_s13, %s1513_s13   ;;  %s1182_s12 = sphi %s1230_s12, %s1512_s12  }
   0x6   : > { %p1260_p1 = scmp.eq.s32.totalorder %s850_s18, 0  ;;  %p852_p2 = scmp.ge.s32.totalorder %s1202_s17, 1 }
   0x7   : > { %p140_p3 = scmp.lt.s32.totalorder %s1202_s17, 3  ;;  %s1204_s22 = smov [#allocation4]  }
   0x8   : > { %p1268_p4 = por %p1260_p1, %p49_p0  ;;  %s154_s23 = sshll.u32 %s1204_s22, 4  ;;  %s155_s23 = int_to_ptr.vmem [resolvable:$true] %s154_s23 }
   0x9   : > { %p1272_p5 = pnand %p852_p2, %p140_p3  ;;  %s29_s25 = sadd.s32 1, %s1198_s16 }
   0xa   : > { %s1105_s26 = scalar_lea.vmem %s155_s23, 512  ;;  %p1113_p12 = scmp.lt.s32.totalorder %s155_s23, %s155_s23 }
   0xb   : > { %p1026_p6 = pneg %p1272_p5  ;;  %p1106_p9 = scmp.ne.s32.totalorder %s155_s23, %s1105_s26 }
   0xc   : > { %p1114_p13 = scmp.lt.s32.totalorder %s1105_s26, %s1105_s26 }
   0xd   : > { %p1280_p7 = pnand %p1026_p6, %p1260_p1 }
   0xe   : > { %p1115_p0 = por %p1114_p13, %p1113_p12 }
   0xf   : > { %p1096_p8 = pneg %p1280_p7 }
  0x11   : > { %p1108_p10 = pnand %p1106_p9, %p1096_p8 }
  0x13   : > { %p1109_p11 = pneg %p1108_p10 }
  0x15   : > { %p1116_p2 = pnand %p1115_p0, %p1109_p11 }
  0x17   : > { %1119 = shalt.err (!%p1116_p2)
}
  0x18   : > { %s1205_s27 = smov 64   ;;  %s1206_s28 = smov 4  }
  0x19   : > { %1029 = dma.hbm_to_vmem [thread:$0]  (!%p1280_p7), %s1504_s1, 512, %s155_s23, [#allocation5], %s1205_s27, %s1205_s27, %s1206_s28  }
  0x1a   : > { %p31_p3 = scmp.ge.s32.totalorder %s29_s25, 2  ;;  %s36_s4 = sadd.s32 1, %s1190_s14 }
  0x1b   : > { %p43_p6 = scmp.ne.s32.totalorder %s1190_s14, %s1186_s13  ;;  %p44_p8 = scmp.eq.s32.totalorder %s1202_s17, 0 }
  0x1c   : > { %s1518_s25 = smov (%p31_p3, %s29_s25), 0  ;;  %p1035_p10 = scmp.lt.s32.totalorder %s1202_s17, 2 }
  0x1d   : > { %p45_p9 = por %p44_p8, %p43_p6  ;;  %s33_s5 = ssub.s32 %s1198_s16, %s1518_s25 }
  0x1e   : > { %s174_s6 = sand.u32 1, %s1190_s14   ;;  %p34_p11 = scmp.eq.s32.totalorder %s33_s5, 0 }
  0x1f   : > { %s856_s7 = sshll.u32 %s174_s6, 8  ;;  %s919_s8 = sshll.u32 %s1198_s16, 12 }
  0x20   : > { %s1304_s9 = scalar_select %p34_p11, %s1190_s14, %s36_s4  }
  0x21   : > { %s184_s12 = scalar_lea.hbm %s1503_s0, %s919_s8  ;;  %s178_s18 = scalar_lea.vmem [#allocation2], %s856_s7 }
  0x22   : > { %s185_s22 = sshll.u32 %s178_s18, 4  ;;  %p1309_p7 = pnand %p1035_p10, %p45_p9  ;;  %s186_s22 = int_to_ptr.vmem [resolvable:$true] %s185_s22 }
  0x23   : > { %s175_s24 = scalar_lea.sflag [#allocation3], %s174_s6  ;;  %s1133_s26 = scalar_lea.vmem %s186_s22, 4096 }
  0x24   : > { %p1122_p12 = pneg %p1309_p7  ;;  %p1134_p13 = scmp.ne.s32.totalorder %s186_s22, %s1133_s26 }
  0x25   : > { %s1207_s27 = smov [#allocation2]  }
  0x26   : > { %p1136_p0 = pnand %p1134_p13, %p1122_p12  ;;  %s1138_s28 = sshll.u32 %s1207_s27, 4  ;;  %s1139_s28 = int_to_ptr.vmem [resolvable:$false] %s1138_s28 }
  0x27   : > { %s1140_s29 = scalar_lea.vmem %s1139_s28, 8192  ;;  %p1141_p3 = scmp.lt.s32.totalorder %s186_s22, %s1139_s28 }
  0x28   : > { %p1137_p2 = pneg %p1136_p0  ;;  %p1142_p6 = scmp.lt.s32.totalorder %s1140_s29, %s1133_s26 }
  0x2a   : > { %p1143_p8 = por %p1142_p6, %p1141_p3 }
  0x2c   : > { %p1144_p9 = pnand %p1143_p8, %p1137_p2 }
  0x2e   : > { %1147 = shalt.err (!%p1144_p9)
}
  0x2f   : > { %s1208_s30 = smov 128   ;;  %s1209_s4 = smov 8  }
  0x30   : > { %1033 = dma.hbm_to_vmem [thread:$0]  (!%p1309_p7), %s184_s12, 4096, %s186_s22, %s175_s24, %s1208_s30, %s1208_s30, %s1209_s4  }
  0x31   : > { %197 = sbr.rel (%p1272_p5) target bundleno = 305 (0x131), region = 32  ;;  %s199_s5 = sand.u32 (!%p1272_p5), 1, %s1186_s13  }
  0x32   : > { %s860_s6 = sshll.u32 (!%p1272_p5), %s199_s5, 8  ;;  %s200_s7 = scalar_lea.sflag (!%p1272_p5), [#allocation3], %s199_s5 }
  0x33   : > { %s1320_s8 = scalar_lea.vmem (!%p1272_p5), [#allocation2], %s860_s6 }
  0x36   : > { %1173 = dma.done.wait (%p1268_p4), %s200_s7, 4096  }
  0x37   : > { %1175 = vsyncadd (%p1268_p4), %s200_s7, 4294963200 }
  0x38   : > { %1177 = dma.done.wait (%p1260_p1), [#allocation5], 512  }
  0x39   : > { %1179 = vsyncadd (%p1260_p1), [#allocation5], 4294966784  ;;  %v1090_v0 = vld [vmem:[#allocation4 + $0x18] sm:$0xff]   ;;  %v1091_v1 = vld [vmem:[#allocation4 + $0x10] sm:$0xff]   ;;  %vm337_vm0 = vcmask 523264   ;;  %s862_s19 = sshll.u32 %s1194_s15, 5 }
  0x3a   : > { %972 = vmatprep.subr.bf16.mxu0 %v1090_v0  ;;  %1012 = vmatprep.subr.bf16.mxu1 %v1090_v0  ;;  %v1092_v2 = vld [vmem:[#allocation4 + $0x8] sm:$0xff]   ;;  %v250_v3 = vld [vmem:[%s1320_s8] sm:$0xff]  ;;  %v252_v10 = vld [vmem:[%s1320_s8 + $0x10] sm:$0xff]  ;;  %p241_p1 = scmp.lt.s32.totalorder %s862_s19, 63  ;;  %vm707_vm1 = vcmask 257024  }
  0x3b   : > { %973 = vmatpush3.bf16.msra.mxu0 %v1090_v0  ;;  %1016 = vmatpush3.bf16.msra.mxu1 %v1090_v0  ;;  %v251_v4 = vld [vmem:[%s1320_s8 + $0x8] sm:$0xff]  ;;  %v266_v5 = vld [vmem:[%s1320_s8 + $0x80] sm:$0xff]  ;;  %v253_v11 = vld [vmem:[%s1320_s8 + $0x18] sm:$0xff] }
  0x3c   : > { %974 = vmatprep.subr.bf16.mxu0 %v1091_v1  ;;  %1013 = vmatprep.subr.bf16.mxu1 %v1091_v1  ;;  %v282_v6 = vpack.c.bf16 %v251_v4, %v250_v3  ;;  %v267_v7 = vld [vmem:[%s1320_s8 + $0x88] sm:$0xff]  ;;  %v1093_v9 = vld [vmem:[#allocation4] sm:$0xff]   ;;  %v268_v12 = vld [vmem:[%s1320_s8 + $0x90] sm:$0xff]  ;;  %v283_v18 = vpack.c.bf16 %v253_v11, %v252_v10  ;;  %s1520_s19 = smov (!%p241_p1, %s862_s19), 63 }
  0x3d   : > { %v290_v8 = vpack.c.bf16 %v267_v7, %v266_v5  ;;  %v269_v13 = vld [vmem:[%s1320_s8 + $0x98] sm:$0xff]  ;;  %v254_v14 = vld [vmem:[%s1320_s8 + $0x20] sm:$0xff]  ;;  %v255_v15 = vld [vmem:[%s1320_s8 + $0x28] sm:$0xff]  ;;  %s863_s10 = sshll.u32 %s1520_s19, 2 }
  0x3e   : > { %980 = vmatprep.mubr.msk.bf16.mxu0 %vm337_vm0, %v282_v6  ;;  %v270_v16 = vld [vmem:[%s1320_s8 + $0xa0] sm:$0xff]  ;;  %v271_v17 = vld [vmem:[%s1320_s8 + $0xa8] sm:$0xff]  ;;  %v291_v19 = vpack.c.bf16 %v269_v13, %v268_v12  ;;  %v284_v20 = vpack.c.bf16 %v255_v15, %v254_v14  ;;  %v256_v22 = vld [vmem:[%s1320_s8 + $0x30] sm:$0xff]  ;;  %s1391_s12 = scalar_lea.vmem %s1506_s3, %s863_s10 }
  0x3f   : > { %975 = vmatpush3.bf16.msra.mxu0 %v1091_v1  ;;  %1017 = vmatpush3.bf16.msra.mxu1 %v1091_v1  ;;  %v292_v21 = vpack.c.bf16 %v271_v17, %v270_v16  ;;  %v257_v23 = vld [vmem:[%s1320_s8 + $0x38] sm:$0xff]  ;;  %v272_v24 = vld [vmem:[%s1320_s8 + $0xb0] sm:$0xff]  ;;  %v258_v26 = vld [vmem:[%s1320_s8 + $0x40] sm:$0xff] }
  0x40   : > { %976 = vmatprep.subr.bf16.mxu0 %v1092_v2  ;;  %1014 = vmatprep.subr.bf16.mxu1 %v1092_v2  ;;  %v273_v25 = vld [vmem:[%s1320_s8 + $0xb8] sm:$0xff]  ;;  %v259_v27 = vld [vmem:[%s1320_s8 + $0x48] sm:$0xff]  ;;  %v274_v28 = vld [vmem:[%s1320_s8 + $0xc0] sm:$0xff]  ;;  %v285_v30 = vpack.c.bf16 %v257_v23, %v256_v22 }
  0x41   : > { %996 = vmatprep.mubr.msk.bf16.mxu1 %vm337_vm0, %v290_v8  ;;  %v275_v29 = vld [vmem:[%s1320_s8 + $0xc8] sm:$0xff]  ;;  %v293_v31 = vpack.c.bf16 %v273_v25, %v272_v24  ;;  %v286_v32 = vpack.c.bf16 %v259_v27, %v258_v26  ;;  %v260_v34 = vld [vmem:[%s1320_s8 + $0x50] sm:$0xff]  ;;  %v261_v35 = vld [vmem:[%s1320_s8 + $0x58] sm:$0xff] }
  0x42   : > { %v294_v33 = vpack.c.bf16 %v275_v29, %v274_v28  ;;  %v276_v36 = vld [vmem:[%s1320_s8 + $0xd0] sm:$0xff]  ;;  %v277_v37 = vld [vmem:[%s1320_s8 + $0xd8] sm:$0xff]  ;;  %v262_v38 = vld [vmem:[%s1320_s8 + $0x60] sm:$0xff]  ;;  %v287_v42 = vpack.c.bf16 %v261_v35, %v260_v34 }
  0x43   : > { %977 = vmatpush3.bf16.msra.mxu0 %v1092_v2  ;;  %1018 = vmatpush3.bf16.msra.mxu1 %v1092_v2  ;;  %v263_v39 = vld [vmem:[%s1320_s8 + $0x68] sm:$0xff]  ;;  %v278_v40 = vld [vmem:[%s1320_s8 + $0xe0] sm:$0xff]  ;;  %v295_v43 = vpack.c.bf16 %v277_v37, %v276_v36  ;;  %v264_v46 = vld [vmem:[%s1320_s8 + $0x70] sm:$0xff] }
  0x44   : > { %978 = vmatprep.subr.bf16.mxu0 %v1093_v9  ;;  %1015 = vmatprep.subr.bf16.mxu1 %v1093_v9  ;;  %v279_v41 = vld [vmem:[%s1320_s8 + $0xe8] sm:$0xff]  ;;  %v288_v44 = vpack.c.bf16 %v263_v39, %v262_v38  ;;  %v265_v47 = vld [vmem:[%s1320_s8 + $0x78] sm:$0xff]  ;;  %v280_v48 = vld [vmem:[%s1320_s8 + $0xf0] sm:$0xff] }
  0x45   : > { %v296_v45 = vpack.c.bf16 %v279_v41, %v278_v40  ;;  %v281_v49 = vld [vmem:[%s1320_s8 + $0xf8] sm:$0xff]  ;;  %v289_v50 = vpack.c.bf16 %v265_v47, %v264_v46  ;;  %v1382_v52 = vld [vmem:[%s1505_s2] ss:$0 sm:$0xff] }
  0x46   : > { %v297_v51 = vpack.c.bf16 %v281_v49, %v280_v48 }
  0x47   : > { %979 = vmatpush3.bf16.msra.mxu0 %v1093_v9  ;;  %1019 = vmatpush3.bf16.msra.mxu1 %v1093_v9 }
  0x4a   : > { %981 = vmatmul.mubr.msk.bf16.vlgmr.msra.gmra.mxu0 %vm337_vm0, %v283_v18  ;;  %997 = vmatmul.mubr.msk.bf16.vlgmr.msra.gmra.mxu1 %vm337_vm0, %v291_v19 }
  0x4b   : > { %984 = vmatprep.mubr.msk.bf16.mxu0 %vm337_vm0, %v284_v20  ;;  %1000 = vmatprep.mubr.msk.bf16.mxu1 %vm337_vm0, %v292_v21 }
  0x52   : > { %985 = vmatmul.mubr.msk.bf16.gmra.mxu0 %vm337_vm0, %v285_v30  ;;  %1001 = vmatmul.mubr.msk.bf16.gmra.mxu1 %vm337_vm0, %v293_v31 }
  0x53   : > { %988 = vmatprep.mubr.msk.bf16.mxu0 %vm337_vm0, %v286_v32  ;;  %1004 = vmatprep.mubr.msk.bf16.mxu1 %vm337_vm0, %v294_v33 }
  0x5a   : > { %989 = vmatmul.mubr.msk.bf16.gmra.mxu0 %vm337_vm0, %v287_v42  ;;  %1005 = vmatmul.mubr.msk.bf16.gmra.mxu1 %vm337_vm0, %v295_v43 }
  0x5b   : > { %992 = vmatprep.mubr.msk.bf16.mxu0 %vm337_vm0, %v288_v44  ;;  %1008 = vmatprep.mubr.msk.bf16.mxu1 %vm337_vm0, %v296_v45 }
  0x62   : > { %993 = vmatmul.mubr.msk.bf16.gmra.mxu0 %vm337_vm0, %v289_v50  ;;  %1009 = vmatmul.mubr.msk.bf16.gmra.mxu1 %vm337_vm0, %v297_v51 }
 0x10a   : > { %v982_v53 = vpop.f32.mrf.mxu0  ;;  %v998_v54 = vpop.f32.mrf.mxu1 }
 0x10b   : > { %v429_v55 = vadd.f32 %v982_v53, %v1382_v52  ;;  %v493_v56 = vadd.f32 %v998_v54, %v1382_v52 }
 0x10c   : > { %v420_v57 = vpop.f32.mrf.mxu0  ;;  %v484_v58 = vpop.f32.mrf.mxu1 }
 0x10d   : > { %v549_v59 = vmax.f32 %v429_v55, 0.0  ;;  %v565_v60 = vmax.f32 %v493_v56, 0.0  ;;  %v421_v61 = vadd.f32 %v1382_v52, %v420_v57  ;;  %v485_v62 = vadd.f32 %v1382_v52, %v484_v58 }
 0x10e   : > { %v983_v63 = vpop.f32.mrf.mxu0  ;;  %v999_v0 = vpop.f32.mrf.mxu1 }
 0x10f   : > { %v922_v1 = vpack.c.bf16 %v549_v59, %v549_v59  ;;  %v938_v2 = vpack.c.bf16 %v565_v60, %v565_v60  ;;  %v547_v3 = vmax.f32 %v421_v61, 0.0  ;;  %v563_v4 = vmax.f32 %v485_v62, 0.0 }
 0x110   : > { %v432_v5 = vadd.f32 %v983_v63, %v1382_v52  ;;  %v496_v6 = vadd.f32 %v999_v0, %v1382_v52  ;;  %v423_v7 = vpop.f32.mrf.mxu0  ;;  %v487_v8 = vpop.f32.mrf.mxu1 }
 0x111   : > { %710 = vst.msk [vmem:[%s1391_s12 + $0x8] sm:$0xf] %vm707_vm1, %v922_v1  ;;  %726 = vst.msk [vmem:[%s1391_s12 + $0x48] sm:$0xf] %vm707_vm1, %v938_v2  ;;  %v920_v9 = vpack.c.bf16 %v547_v3, %v547_v3  ;;  %v936_v10 = vpack.c.bf16 %v563_v4, %v563_v4  ;;  %v424_v11 = vadd.f32 %v1382_v52, %v423_v7 }
 0x112   : > { %v488_v12 = vadd.f32 %v1382_v52, %v487_v8  ;;  %v550_v13 = vmax.f32 %v432_v5, 0.0  ;;  %v566_v14 = vmax.f32 %v496_v6, 0.0  ;;  %v986_v15 = vpop.f32.mrf.mxu0  ;;  %v1002_v16 = vpop.f32.mrf.mxu1 }
 0x113   : > { %708 = vst.msk [vmem:[%s1391_s12] sm:$0xf] %vm707_vm1, %v920_v9  ;;  %724 = vst.msk [vmem:[%s1391_s12 + $0x40] sm:$0xf] %vm707_vm1, %v936_v10  ;;  %v548_v17 = vmax.f32 %v424_v11, 0.0  ;;  %v445_v19 = vadd.f32 %v986_v15, %v1382_v52  ;;  %v509_v20 = vadd.f32 %v1002_v16, %v1382_v52 }
 0x114   : > { %v564_v18 = vmax.f32 %v488_v12, 0.0  ;;  %v923_v21 = vpack.c.bf16 %v550_v13, %v550_v13  ;;  %v939_v22 = vpack.c.bf16 %v566_v14, %v566_v14  ;;  %v436_v23 = vpop.f32.mrf.mxu0  ;;  %v500_v24 = vpop.f32.mrf.mxu1 }
 0x115   : > { %v921_v25 = vpack.c.bf16 %v548_v17, %v548_v17  ;;  %v553_v27 = vmax.f32 %v445_v19, 0.0  ;;  %v569_v28 = vmax.f32 %v509_v20, 0.0  ;;  %v437_v29 = vadd.f32 %v1382_v52, %v436_v23 }
 0x116   : > { %v937_v26 = vpack.c.bf16 %v564_v18, %v564_v18  ;;  %711 = vst.msk [vmem:[%s1391_s12 + $0xc] sm:$0xf] %vm707_vm1, %v923_v21  ;;  %727 = vst.msk [vmem:[%s1391_s12 + $0x4c] sm:$0xf] %vm707_vm1, %v939_v22  ;;  %v501_v30 = vadd.f32 %v1382_v52, %v500_v24  ;;  %v987_v31 = vpop.f32.mrf.mxu0  ;;  %v1003_v32 = vpop.f32.mrf.mxu1 }
 0x117   : > { %709 = vst.msk [vmem:[%s1391_s12 + $0x4] sm:$0xf] %vm707_vm1, %v921_v25  ;;  %v926_v33 = vpack.c.bf16 %v553_v27, %v553_v27  ;;  %v942_v34 = vpack.c.bf16 %v569_v28, %v569_v28  ;;  %v448_v35 = vadd.f32 %v987_v31, %v1382_v52  ;;  %v512_v36 = vadd.f32 %v1003_v32, %v1382_v52 }
 0x118   : > { %725 = vst.msk [vmem:[%s1391_s12 + $0x44] sm:$0xf] %vm707_vm1, %v937_v26  ;;  %v551_v37 = vmax.f32 %v437_v29, 0.0  ;;  %v567_v38 = vmax.f32 %v501_v30, 0.0  ;;  %v439_v39 = vpop.f32.mrf.mxu0  ;;  %v503_v40 = vpop.f32.mrf.mxu1 }
 0x119   : > { %714 = vst.msk [vmem:[%s1391_s12 + $0x18] sm:$0xf] %vm707_vm1, %v926_v33  ;;  %730 = vst.msk [vmem:[%s1391_s12 + $0x58] sm:$0xf] %vm707_vm1, %v942_v34  ;;  %v554_v41 = vmax.f32 %v448_v35, 0.0  ;;  %v570_v42 = vmax.f32 %v512_v36, 0.0  ;;  %v440_v43 = vadd.f32 %v1382_v52, %v439_v39  ;;  %v504_v44 = vadd.f32 %v1382_v52, %v503_v40 }
 0x11a   : > { %v924_v45 = vpack.c.bf16 %v551_v37, %v551_v37  ;;  %v940_v46 = vpack.c.bf16 %v567_v38, %v567_v38  ;;  %v990_v47 = vpop.f32.mrf.mxu0  ;;  %v1006_v48 = vpop.f32.mrf.mxu1 }
 0x11b   : > { %v927_v49 = vpack.c.bf16 %v554_v41, %v554_v41  ;;  %v943_v50 = vpack.c.bf16 %v570_v42, %v570_v42  ;;  %v552_v51 = vmax.f32 %v440_v43, 0.0  ;;  %v568_v53 = vmax.f32 %v504_v44, 0.0 }
 0x11c   : > { %712 = vst.msk [vmem:[%s1391_s12 + $0x10] sm:$0xf] %vm707_vm1, %v924_v45  ;;  %728 = vst.msk [vmem:[%s1391_s12 + $0x50] sm:$0xf] %vm707_vm1, %v940_v46  ;;  %v461_v54 = vadd.f32 %v990_v47, %v1382_v52  ;;  %v525_v55 = vadd.f32 %v1006_v48, %v1382_v52  ;;  %v452_v56 = vpop.f32.mrf.mxu0  ;;  %v516_v57 = vpop.f32.mrf.mxu1 }
 0x11d   : > { %715 = vst.msk [vmem:[%s1391_s12 + $0x1c] sm:$0xf] %vm707_vm1, %v927_v49  ;;  %731 = vst.msk [vmem:[%s1391_s12 + $0x5c] sm:$0xf] %vm707_vm1, %v943_v50  ;;  %v925_v58 = vpack.c.bf16 %v552_v51, %v552_v51  ;;  %v941_v59 = vpack.c.bf16 %v568_v53, %v568_v53  ;;  %v453_v60 = vadd.f32 %v1382_v52, %v452_v56 }
 0x11e   : > { %v517_v61 = vadd.f32 %v1382_v52, %v516_v57  ;;  %v557_v62 = vmax.f32 %v461_v54, 0.0  ;;  %v573_v63 = vmax.f32 %v525_v55, 0.0  ;;  %v991_v0 = vpop.f32.mrf.mxu0  ;;  %v1007_v1 = vpop.f32.mrf.mxu1 }
 0x11f   : > { %713 = vst.msk [vmem:[%s1391_s12 + $0x14] sm:$0xf] %vm707_vm1, %v925_v58  ;;  %729 = vst.msk [vmem:[%s1391_s12 + $0x54] sm:$0xf] %vm707_vm1, %v941_v59  ;;  %v555_v2 = vmax.f32 %v453_v60, 0.0  ;;  %v464_v4 = vadd.f32 %v991_v0, %v1382_v52  ;;  %v528_v5 = vadd.f32 %v1007_v1, %v1382_v52 }
 0x120   : > { %v571_v3 = vmax.f32 %v517_v61, 0.0  ;;  %v930_v6 = vpack.c.bf16 %v557_v62, %v557_v62  ;;  %v946_v7 = vpack.c.bf16 %v573_v63, %v573_v63  ;;  %v455_v8 = vpop.f32.mrf.mxu0  ;;  %v519_v9 = vpop.f32.mrf.mxu1 }
 0x121   : > { %v928_v10 = vpack.c.bf16 %v555_v2, %v555_v2  ;;  %v558_v12 = vmax.f32 %v464_v4, 0.0  ;;  %v574_v13 = vmax.f32 %v528_v5, 0.0  ;;  %v456_v14 = vadd.f32 %v1382_v52, %v455_v8 }
 0x122   : > { %v944_v11 = vpack.c.bf16 %v571_v3, %v571_v3  ;;  %718 = vst.msk [vmem:[%s1391_s12 + $0x28] sm:$0xf] %vm707_vm1, %v930_v6  ;;  %734 = vst.msk [vmem:[%s1391_s12 + $0x68] sm:$0xf] %vm707_vm1, %v946_v7  ;;  %v520_v15 = vadd.f32 %v1382_v52, %v519_v9  ;;  %v994_v16 = vpop.f32.mrf.mxu0  ;;  %v1010_v17 = vpop.f32.mrf.mxu1 }
 0x123   : > { %716 = vst.msk [vmem:[%s1391_s12 + $0x20] sm:$0xf] %vm707_vm1, %v928_v10  ;;  %v931_v18 = vpack.c.bf16 %v558_v12, %v558_v12  ;;  %v947_v19 = vpack.c.bf16 %v574_v13, %v574_v13  ;;  %v477_v20 = vadd.f32 %v994_v16, %v1382_v52  ;;  %v541_v21 = vadd.f32 %v1010_v17, %v1382_v52 }
 0x124   : > { %732 = vst.msk [vmem:[%s1391_s12 + $0x60] sm:$0xf] %vm707_vm1, %v944_v11  ;;  %v556_v22 = vmax.f32 %v456_v14, 0.0  ;;  %v572_v23 = vmax.f32 %v520_v15, 0.0  ;;  %v468_v24 = vpop.f32.mrf.mxu0  ;;  %v532_v25 = vpop.f32.mrf.mxu1 }
 0x125   : > { %719 = vst.msk [vmem:[%s1391_s12 + $0x2c] sm:$0xf] %vm707_vm1, %v931_v18  ;;  %735 = vst.msk [vmem:[%s1391_s12 + $0x6c] sm:$0xf] %vm707_vm1, %v947_v19  ;;  %v561_v26 = vmax.f32 %v477_v20, 0.0  ;;  %v577_v27 = vmax.f32 %v541_v21, 0.0  ;;  %v469_v28 = vadd.f32 %v1382_v52, %v468_v24  ;;  %v533_v29 = vadd.f32 %v1382_v52, %v532_v25 }
 0x126   : > { %v929_v30 = vpack.c.bf16 %v556_v22, %v556_v22  ;;  %v945_v31 = vpack.c.bf16 %v572_v23, %v572_v23  ;;  %v995_v32 = vpop.f32.mrf.mxu0  ;;  %v1011_v33 = vpop.f32.mrf.mxu1 }
 0x127   : > { %v934_v34 = vpack.c.bf16 %v561_v26, %v561_v26  ;;  %v950_v35 = vpack.c.bf16 %v577_v27, %v577_v27  ;;  %v559_v36 = vmax.f32 %v469_v28, 0.0  ;;  %v575_v37 = vmax.f32 %v533_v29, 0.0 }
 0x128   : > { %717 = vst.msk [vmem:[%s1391_s12 + $0x24] sm:$0xf] %vm707_vm1, %v929_v30  ;;  %733 = vst.msk [vmem:[%s1391_s12 + $0x64] sm:$0xf] %vm707_vm1, %v945_v31  ;;  %v480_v38 = vadd.f32 %v995_v32, %v1382_v52  ;;  %v544_v39 = vadd.f32 %v1011_v33, %v1382_v52  ;;  %v471_v40 = vpop.f32.mrf.mxu0  ;;  %v535_v41 = vpop.f32.mrf.mxu1 }
 0x129   : > { %722 = vst.msk [vmem:[%s1391_s12 + $0x38] sm:$0xf] %vm707_vm1, %v934_v34  ;;  %738 = vst.msk [vmem:[%s1391_s12 + $0x78] sm:$0xf] %vm707_vm1, %v950_v35  ;;  %v932_v42 = vpack.c.bf16 %v559_v36, %v559_v36  ;;  %v948_v43 = vpack.c.bf16 %v575_v37, %v575_v37  ;;  %v472_v44 = vadd.f32 %v1382_v52, %v471_v40 }
 0x12a   : > { %v536_v45 = vadd.f32 %v1382_v52, %v535_v41  ;;  %v562_v46 = vmax.f32 %v480_v38, 0.0  ;;  %v578_v47 = vmax.f32 %v544_v39, 0.0 }
 0x12b   : > { %720 = vst.msk [vmem:[%s1391_s12 + $0x30] sm:$0xf] %vm707_vm1, %v932_v42  ;;  %736 = vst.msk [vmem:[%s1391_s12 + $0x70] sm:$0xf] %vm707_vm1, %v948_v43  ;;  %v560_v48 = vmax.f32 %v472_v44, 0.0 }
 0x12c   : > { %v576_v49 = vmax.f32 %v536_v45, 0.0  ;;  %v935_v50 = vpack.c.bf16 %v562_v46, %v562_v46  ;;  %v951_v51 = vpack.c.bf16 %v578_v47, %v578_v47 }
 0x12d   : > { %v933_v53 = vpack.c.bf16 %v560_v48, %v560_v48 }
 0x12e   : > { %v949_v54 = vpack.c.bf16 %v576_v49, %v576_v49  ;;  %723 = vst.msk [vmem:[%s1391_s12 + $0x3c] sm:$0xf] %vm707_vm1, %v935_v50  ;;  %739 = vst.msk [vmem:[%s1391_s12 + $0x7c] sm:$0xf] %vm707_vm1, %v951_v51 }
 0x12f   : > { %721 = vst.msk [vmem:[%s1391_s12 + $0x34] sm:$0xf] %vm707_vm1, %v933_v53 }
 0x130   : > { %737 = vst.msk [vmem:[%s1391_s12 + $0x74] sm:$0xf] %vm707_vm1, %v949_v54 }
 0x131 PF: > { %s17_s17 = sadd.s32 1, %s1202_s17   ;;  %s1512_s12 = smov %s1186_s13 }
 0x132   : > { %p14_p4 = scmp.ge.s32.totalorder %s17_s17, 4   ;;  %s1513_s13 = smov %s1190_s14 }
 0x133   : > { %s1514_s14 = smov %s1304_s9  ;;  %s1515_s15 = smov %s1198_s16 }
 0x134   : > { %s1516_s16 = smov %s1518_s25  ;;  %16 = sbr.rel (!%p14_p4) target bundleno = 5 (0x5), region = 80 }
 0x139   :  { %768 = vsyncpa [#allocation3], 1 }
 0x13a   :  { %770 = vsyncpa [#allocation3 + $0x1], 1 }
 0x13b   :  { %771 = vsyncpa [#allocation5], 1 }

// kernel: _lambda_.7
= control target key start
LH: loop header
LB: loop body
LE: loop exit
PB: predicated region body
PF: predicated region fallthrough
CT: control target
= control target key end

     0   :  { %s694_s18 = smov 0   ;;  %s761_s0 = inlined_call_operand.vmem [shape: bf16[2,64,32], index: 0, kind: input, shape index: {}]   ;;  %s762_s1 = inlined_call_operand.vmem [shape: bf16[32,128], index: 1, kind: input, shape index: {}]   ;;  %s763_s2 = inlined_call_operand.vmem [shape: f32[1,128], index: 2, kind: input, shape index: {}]   ;;  %s764_s3 = inlined_call_operand.vmem [shape: f32[2,64,128], index: 3, kind: output, shape index: {0}]   ;;  %s765_s4 = inlined_call_operand.vmem [shape: f32[2,2,128], index: 4, kind: output, shape index: {1}]   ;;  %s766_s5 = inlined_call_operand.vmem [shape: f32[2,64,2], index: 5, kind: output, shape index: {2}]  }
   0x1 LB: > { %s592_s19 = sadd.s32 4294967295, %s662_s18   ;;  %p596_p0 = scmp.ge.s32.totalorder %s662_s18, 1  ;;  %s662_s18 = sphi %s694_s18, %s16_s18  }
   0x2   : > { %p192_p1 = scmp.lt.s32.totalorder %s662_s18, 3 }
   0x4   : > { %p193_p2 = pnand %p596_p0, %p192_p1 }
   0x5   : > { %p229_p3 = scmp.lt.s32.totalorder (!%p193_p2), %s592_s19, 1 }
   0x6   : > { %196 = sbr.rel (%p193_p2) target bundleno = 383 (0x17f), region = 32 }
   0xb   : > { %v650_v0 = vld [vmem:[%s762_s1 + $0x8] sm:$0xff]   ;;  %v651_v1 = vld [vmem:[%s762_s1] sm:$0xff]   ;;  %s768_s19 = smov (!%p229_p3, %s592_s19), 1  ;;  %vm300_vm0 = vcmask 261120   ;;  %vm420_vm1 = vcmask 1040384   ;;  %vm455_vm2 = vcmask 7168  }
   0xc   : > { %626 = vmatprep.subr.bf16.mxu0 %v650_v0  ;;  %638 = vmatprep.subr.bf16.mxu1 %v650_v0  ;;  %s617_s24 = sshll.u32 %s768_s19, 5  ;;  %s618_s28 = sshll.u32 %s768_s19, 6  ;;  %v604_v6 = vld [vmem:[%s763_s2] ss:$0 sm:$0xff]  ;;  %vm464_vm3 = vcmask 15360  }
   0xd   : > { %627 = vmatpush3.bf16.msra.mxu0 %v650_v0  ;;  %640 = vmatpush3.bf16.msra.mxu1 %v650_v0  ;;  %s233_s27 = scalar_lea.vmem %s761_s0, %s617_s24  ;;  %s723_s8 = scalar_lea.vmem %s764_s3, %s618_s28 }
   0xe   : > { %628 = vmatprep.subr.bf16.mxu0 %v651_v1  ;;  %639 = vmatprep.subr.bf16.mxu1 %v651_v1  ;;  %v652_v2 = vld [vmem:[%s233_s27] sm:$0xff]   ;;  %v653_v3 = vld [vmem:[%s233_s27 + $0x10] sm:$0xff]   ;;  %v654_v4 = vld [vmem:[%s233_s27 + $0x8] sm:$0xff]   ;;  %s601_s9 = sshll.u32 %s768_s19, 1  ;;  %s247_s15 = scalar_lea.vmem %s766_s5, %s618_s28 }
   0xf   : > { %630 = vmatprep.mubr.msk.bf16.mxu0 %vm300_vm0, %v652_v2  ;;  %634 = vmatprep.mubr.msk.bf16.mxu1 %vm300_vm0, %v653_v3  ;;  %v655_v5 = vld [vmem:[%s233_s27 + $0x18] sm:$0xff]   ;;  %s242_s12 = scalar_lea.vmem %s765_s4, %s601_s9 }
  0x11   : > { %629 = vmatpush3.bf16.msra.mxu0 %v651_v1  ;;  %641 = vmatpush3.bf16.msra.mxu1 %v651_v1 }
  0x14   : > { %631 = vmatmul.mubr.msk.bf16.vlgmr.msra.gmra.mxu0 %vm300_vm0, %v654_v4  ;;  %635 = vmatmul.mubr.msk.bf16.vlgmr.msra.gmra.mxu1 %vm300_vm0, %v655_v5 }
  0xd4   : > { %v632_v7 = vpop.f32.mrf.mxu0  ;;  %v636_v9 = vpop.f32.mrf.mxu1 }
  0xd5   : > { %v356_v8 = vadd.f32 %v632_v7, %v604_v6  ;;  %v372_v10 = vadd.f32 %v636_v9, %v604_v6 }
  0xd6   : > { %v347_v11 = vpop.f32.mrf.mxu0  ;;  %v363_v13 = vpop.f32.mrf.mxu1 }
  0xd7   : > { %380 = vst [vmem:[%s723_s8 + $0x10] sm:$0xff] %v356_v8  ;;  %v348_v12 = vadd.f32 %v604_v6, %v347_v11  ;;  %427 = vadd.xlane.f32.xlu1 %v356_v8  ;;  %384 = vst [vmem:[%s723_s8 + $0x30] sm:$0xff] %v372_v10  ;;  %v364_v14 = vadd.f32 %v604_v6, %v363_v13  ;;  %435 = vadd.xlane.f32.xlu0 %v372_v10 }
  0xd8   : > { %v633_v15 = vpop.f32.mrf.mxu0  ;;  %v637_v17 = vpop.f32.mrf.mxu1  ;;  %v388_v27 = vmul.f32 %v356_v8, %v356_v8  ;;  %v392_v40 = vmul.f32 %v372_v10, %v372_v10 }
  0xd9   : > { %378 = vst [vmem:[%s723_s8] sm:$0xff] %v348_v12  ;;  %v359_v16 = vadd.f32 %v633_v15, %v604_v6  ;;  %382 = vst [vmem:[%s723_s8 + $0x20] sm:$0xff] %v364_v14  ;;  %v375_v18 = vadd.f32 %v637_v17, %v604_v6  ;;  %v386_v24 = vmul.f32 %v348_v12, %v348_v12 }
  0xda   : > { %v350_v19 = vpop.f32.mrf.mxu0  ;;  %v366_v21 = vpop.f32.mrf.mxu1  ;;  %v390_v33 = vmul.f32 %v364_v14, %v364_v14 }
  0xdb   : > { %381 = vst [vmem:[%s723_s8 + $0x18] sm:$0xff] %v359_v16  ;;  %v351_v20 = vadd.f32 %v604_v6, %v350_v19  ;;  %429 = vadd.xlane.f32.xlu1 %v359_v16  ;;  %385 = vst [vmem:[%s723_s8 + $0x38] sm:$0xff] %v375_v18  ;;  %v367_v22 = vadd.f32 %v604_v6, %v366_v21  ;;  %423 = vadd.xlane.f32.xlu0 %v348_v12 }
  0xdc   : > { %v389_v30 = vmul.f32 %v359_v16, %v359_v16  ;;  %v393_v42 = vmul.f32 %v375_v18, %v375_v18 }
  0xdd   : > { %379 = vst [vmem:[%s723_s8 + $0x8] sm:$0xff] %v351_v20  ;;  %v394_v23 = vadd.f32 %v351_v20, %v348_v12  ;;  %v387_v25 = vmul.f32 %v351_v20, %v351_v20  ;;  %383 = vst [vmem:[%s723_s8 + $0x28] sm:$0xff] %v367_v22  ;;  %v391_v37 = vmul.f32 %v367_v22, %v367_v22 }
  0xdf   : > { %v395_v26 = vadd.f32 %v394_v23, %v356_v8  ;;  %437 = vadd.xlane.f32.xlu1 %v375_v18  ;;  %v407_v28 = vadd.f32 %v387_v25, %v386_v24  ;;  %431 = vadd.xlane.f32.xlu0 %v364_v14 }
  0xe1   : > { %v396_v29 = vadd.f32 %v395_v26, %v359_v16  ;;  %v408_v31 = vadd.f32 %v407_v28, %v388_v27 }
  0xe3   : > { %v397_v32 = vadd.f32 %v396_v29, %v364_v14  ;;  %433 = vadd.xlane.f32.xlu1 %v367_v22  ;;  %v409_v34 = vadd.f32 %v408_v31, %v389_v30  ;;  %443 = vadd.xlane.f32.xlu0 %v388_v27 }
  0xe5   : > { %v398_v35 = vadd.f32 %v397_v32, %v367_v22  ;;  %v410_v36 = vadd.f32 %v409_v34, %v390_v33 }
  0xe7   : > { %v399_v38 = vadd.f32 %v398_v35, %v372_v10  ;;  %445 = vadd.xlane.f32.xlu1 %v389_v30  ;;  %v411_v39 = vadd.f32 %v410_v36, %v391_v37  ;;  %439 = vadd.xlane.f32.xlu0 %v386_v24 }
  0xe9   : > { %v400_v41 = vadd.f32 %v399_v38, %v375_v18  ;;  %v412_v43 = vadd.f32 %v411_v39, %v392_v40 }
  0xeb   : > { %v401_v44 = vrot.slane %v400_v41, 4  ;;  %441 = vadd.xlane.f32.xlu1 %v387_v25  ;;  %v413_v45 = vadd.f32 %v412_v43, %v393_v42  ;;  %447 = vadd.xlane.f32.xlu0 %v390_v33 }
  0xed   : > { %v402_v46 = vadd.f32 %v401_v44, %v400_v41  ;;  %v414_v47 = vrot.slane %v413_v45, 4 }
  0xef   : > { %v403_v48 = vrot.slane %v402_v46, 2  ;;  %449 = vadd.xlane.f32.xlu1 %v391_v37  ;;  %v415_v49 = vadd.f32 %v414_v47, %v413_v45  ;;  %425 = vadd.xlane.f32.xlu0 %v351_v20 }
  0xf1   : > { %v404_v50 = vadd.f32 %v403_v48, %v402_v46  ;;  %v416_v51 = vrot.slane %v415_v49, 2 }
  0xf3   : > { %v405_v52 = vrot.slane %v404_v50, 1  ;;  %453 = vadd.xlane.f32.xlu1 %v393_v42  ;;  %v417_v53 = vadd.f32 %v416_v51, %v415_v49  ;;  %451 = vadd.xlane.f32.xlu0 %v392_v40 }
  0xf5   : > { %v418_v54 = vrot.slane %v417_v53, 1  ;;  %v406_v55 = vadd.f32 %v405_v52, %v404_v50 }
  0xf7   : > { %v419_v56 = vadd.f32 %v418_v54, %v417_v53 }
  0xf9   : > { %v421_v57 = vsel %vm420_vm1, %v406_v55, %v419_v56 }
  0xfa   : > { %422 = vst [vmem:[%s242_s12] sm:$0x3] %v421_v57 }
 0x160   : > { %v428_v58 = vpop.xlane.xlu1 %427  ;;  %v436_v59 = vpop.xlane.xlu0 %435 }
 0x164   : > { %v430_v60 = vpop.xlane.xlu1 %429  ;;  %v424_v61 = vpop.xlane.xlu0 %423 }
 0x168   : > { %v438_v62 = vpop.xlane.xlu1 %437  ;;  %v432_v63 = vpop.xlane.xlu0 %431 }
 0x16c   : > { %v434_v0 = vpop.xlane.xlu1 %433  ;;  %v444_v1 = vpop.xlane.xlu0 %443 }
 0x16d   : > { %v458_v2 = vsel %vm455_vm2, %v428_v58, %v444_v1 }
 0x16e   : > { %467 = vst.msk [vmem:[%s247_s15 + $0x10] sm:$0xff] %vm464_vm3, %v458_v2 }
 0x170   : > { %v446_v3 = vpop.xlane.xlu1 %445  ;;  %v440_v5 = vpop.xlane.xlu0 %439 }
 0x171   : > { %v459_v4 = vsel %vm455_vm2, %v430_v60, %v446_v3  ;;  %v456_v6 = vsel %vm455_vm2, %v424_v61, %v440_v5 }
 0x172   : > { %468 = vst.msk [vmem:[%s247_s15 + $0x18] sm:$0xff] %vm464_vm3, %v459_v4  ;;  %465 = vst.msk [vmem:[%s247_s15] sm:$0xff] %vm464_vm3, %v456_v6 }
 0x174   : > { %v442_v7 = vpop.xlane.xlu1 %441  ;;  %v448_v8 = vpop.xlane.xlu0 %447 }
 0x175   : > { %v460_v9 = vsel %vm455_vm2, %v432_v63, %v448_v8 }
 0x176   : > { %469 = vst.msk [vmem:[%s247_s15 + $0x20] sm:$0xff] %vm464_vm3, %v460_v9 }
 0x178   : > { %v450_v10 = vpop.xlane.xlu1 %449  ;;  %v426_v12 = vpop.xlane.xlu0 %425 }
 0x179   : > { %v461_v11 = vsel %vm455_vm2, %v434_v0, %v450_v10  ;;  %v457_v13 = vsel %vm455_vm2, %v426_v12, %v442_v7 }
 0x17a   : > { %470 = vst.msk [vmem:[%s247_s15 + $0x28] sm:$0xff] %vm464_vm3, %v461_v11  ;;  %466 = vst.msk [vmem:[%s247_s15 + $0x8] sm:$0xff] %vm464_vm3, %v457_v13 }
 0x17c   : > { %v454_v14 = vpop.xlane.xlu1 %453  ;;  %v452_v16 = vpop.xlane.xlu0 %451 }
 0x17d   : > { %v463_v15 = vsel %vm455_vm2, %v438_v62, %v454_v14  ;;  %v462_v17 = vsel %vm455_vm2, %v436_v59, %v452_v16 }
 0x17e   : > { %472 = vst.msk [vmem:[%s247_s15 + $0x38] sm:$0xff] %vm464_vm3, %v463_v15  ;;  %471 = vst.msk [vmem:[%s247_s15 + $0x30] sm:$0xff] %vm464_vm3, %v462_v17 }
 0x17f PF: > { %s16_s18 = sadd.s32 1, %s662_s18  }
 0x180   : > { %p13_p4 = scmp.ge.s32.totalorder %s16_s18, 4  }
 0x182   :  { %15 = sbr.rel (!%p13_p4) target bundleno = 1 (0x1), region = 86 }

// kernel: _lambda_.6
= control target key start
LH: loop header
LB: loop body
LE: loop exit
PB: predicated region body
PF: predicated region fallthrough
CT: control target
= control target key end

     0   :  { %s2256_s12 = smov 0   ;;  %s2578_s0 = inlined_call_operand.vmem [shape: bf16[2,36,9,32], index: 0, kind: input, shape index: {}]   ;;  %s2579_s1 = inlined_call_operand.vmem [shape: bf16[9,32,32], index: 1, kind: input, shape index: {}]   ;;  %s2580_s2 = inlined_call_operand.vmem [shape: f32[1,32], index: 2, kind: input, shape index: {}]   ;;  %s2581_s3 = inlined_call_operand.vmem [shape: bf16[2,64,32], index: 3, kind: output, shape index: {}]  }
   0x1 LB: > { %s1789_s13 = sadd.s32 4294967295, %s2234_s12   ;;  %p1793_p0 = scmp.ge.s32.totalorder %s2234_s12, 1  ;;  %s2234_s12 = sphi %s2256_s12, %s13_s12  }
   0x2   : > { %p137_p1 = scmp.lt.s32.totalorder %s2234_s12, 3 }
   0x4   : > { %p138_p2 = pnand %p1793_p0, %p137_p1 }
   0x5   : > { %p161_p3 = scmp.lt.s32.totalorder (!%p138_p2), %s1789_s13, 1 }
   0x6   : > { %141 = sbr.rel (%p138_p2) target bundleno = 300 (0x12c), region = 32 }
   0xb   : > { %v2186_v0 = vld [vmem:[%s2579_s1 + $0x18] sm:$0xff]   ;;  %v2187_v1 = vld [vmem:[%s2579_s1 + $0x10] sm:$0xff]   ;;  %s2585_s13 = smov (!%p161_p3, %s1789_s13), 1  ;;  %v2192_v2 = vld [vmem:[%s2579_s1 + $0x8] sm:$0xff]   ;;  %vm230_vm0 = vcmask 261120   ;;  %vm1725_vm4 = vcmask 257024  }
   0xc   : > { %2065 = vmatprep.subr.bf16.mxu0 %v2186_v0  ;;  %2173 = vmatprep.subr.bf16.mxu1 %v2186_v0  ;;  %s2177_s20 = smul.u32 288, %s2585_s13  ;;  %v2193_v3 = vld [vmem:[%s2579_s1 + $0x28] sm:$0xff]   ;;  %v2195_v5 = vld [vmem:[%s2579_s1 + $0x20] sm:$0xff]   ;;  %vm433_vm1 = vsmask.f32 3328  ;;  %v2198_v22 = vld [vmem:[%s2579_s1 + $0x38] sm:$0xff]  }
   0xd   : > { %2066 = vmatpush3.bf16.msra.mxu0 %v2186_v0  ;;  %2175 = vmatpush3.bf16.msra.mxu1 %v2186_v0  ;;  %v2194_v7 = vld [vmem:[%s2579_s1] sm:$0xff]   ;;  %vm434_vm2 = vsmask.f32 7440  ;;  %v2311_v23 = vld [vmem:[%s2579_s1 + $0x48] sm:$0xff]   ;;  %v2202_v38 = vld [vmem:[%s2579_s1 + $0x30] sm:$0xff]   ;;  %s2002_s4 = sshll.u32 %s2585_s13, 5 }
   0xe   : > { %2067 = vmatprep.subr.bf16.mxu0 %v2187_v1  ;;  %2174 = vmatprep.subr.bf16.mxu1 %v2187_v1  ;;  %s2282_s25 = scalar_lea.vmem %s2578_s0, %s2177_s20  ;;  %vm2323_vm3 = vmor %vm433_vm1, %vm434_vm2  ;;  %s2549_s13 = scalar_lea.vmem %s2581_s3, %s2002_s4 }
   0xf   : > { %v2188_v4 = vld [vmem:[%s2282_s25 + $0x48] ss:$8 sps:$4 sm:$0xff]   ;;  %v2190_v8 = vld [vmem:[%s2282_s25 + $0x58] ss:$8 sps:$4 sm:$0xff]   ;;  %v418_v12 = vld [vmem:[%s2282_s25 + $0x4] sm:$0x1] }
  0x10   : > { %v2189_v6 = vld [vmem:[%s2282_s25 + $0x68] ss:$8 sps:$4 sm:$0xff]   ;;  %2069 = vmatprep.mubr.msk.bf16.mxu0 %vm230_vm0, %v2188_v4  ;;  %v2191_v9 = vld [vmem:[%s2282_s25 + $0x78] ss:$8 sps:$4 sm:$0xff]   ;;  %v420_v15 = vld [vmem:[%s2282_s25 + $0xc] sm:$0x1] }
  0x11   : > { %2068 = vmatpush3.bf16.msra.mxu0 %v2187_v1  ;;  %2176 = vmatpush3.bf16.msra.mxu1 %v2187_v1  ;;  %v2196_v10 = vld [vmem:[%s2282_s25] ss:$8 sps:$4 sm:$0xff]   ;;  %v2197_v14 = vld [vmem:[%s2282_s25 + $0x10] ss:$8 sps:$4 sm:$0xff]   ;;  %v446_v18 = vshll.u32 %v418_v12, 16  ;;  %v460_v21 = vshll.u32 %v420_v15, 16 }
  0x12   : > { %2077 = vmatprep.subr.bf16.mxu1 %v2192_v2  ;;  %2089 = vmatprep.subr.bf16.mxu0 %v2193_v3  ;;  %v417_v11 = vld [vmem:[%s2282_s25] sm:$0xf]  ;;  %v419_v13 = vld [vmem:[%s2282_s25 + $0x8] sm:$0xf]  ;;  %v421_v28 = vld [vmem:[%s2282_s25 + $0x10] sm:$0xf] }
  0x13   : > { %2073 = vmatprep.mubr.msk.bf16.mxu1 %vm230_vm0, %v2189_v6  ;;  %v437_v16 = vshrl.u32 %v417_v11, 16  ;;  %v440_v17 = vshll.u32 %v417_v11, 16  ;;  %v451_v19 = vshrl.u32 %v419_v13, 16  ;;  %v454_v20 = vshll.u32 %v419_v13, 16  ;;  %v422_v31 = vld [vmem:[%s2282_s25 + $0x14] sm:$0x1] }
  0x14   : > { %2070 = vmatmul.mubr.msk.bf16.vlgmr.msra.gmra.mxu0 %vm230_vm0, %v2190_v8  ;;  %2074 = vmatmul.mubr.msk.bf16.vlgmr.msra.gmra.mxu1 %vm230_vm0, %v2191_v9  ;;  %v448_v26 = vrot.slane %v446_v18, 5  ;;  %v462_v30 = vrot.slane %v460_v21, 5  ;;  %v423_v32 = vld [vmem:[%s2282_s25 + $0x18] sm:$0xf]  ;;  %v424_v34 = vld [vmem:[%s2282_s25 + $0x1c] sm:$0x1] }
  0x15   : > { %2090 = vmatpush3.bf16.msra.mxu0 %v2193_v3  ;;  %2078 = vmatpush3.bf16.msra.mxu1 %v2192_v2  ;;  %v439_v24 = vrot.slane %v437_v16, 4  ;;  %v442_v25 = vrot.slane %v440_v17, 5  ;;  %v453_v27 = vrot.slane %v451_v19, 4  ;;  %v456_v29 = vrot.slane %v454_v20, 5  ;;  %v2200_v54 = vld [vmem:[%s2282_s25 + $0x20] ss:$8 sps:$4 sm:$0xff]  }
  0x16   : > { %2091 = vmatprep.subr.bf16.mxu0 %v2195_v5  ;;  %2079 = vmatprep.subr.bf16.mxu1 %v2194_v7  ;;  %v465_v35 = vshrl.u32 %v421_v28, 16  ;;  %v468_v36 = vshll.u32 %v421_v28, 16  ;;  %v474_v37 = vshll.u32 %v422_v31, 16  ;;  %v479_v41 = vshrl.u32 %v423_v32, 16  ;;  %v2201_v57 = vld [vmem:[%s2282_s25 + $0x30] ss:$8 sps:$4 sm:$0xff]  }
  0x17   : > { %2081 = vmatprep.mubr.msk.bf16.mxu1 %vm230_vm0, %v2196_v10  ;;  %v443_v33 = vor.u32 %v442_v25, %v439_v24  ;;  %v457_v40 = vor.u32 %v456_v29, %v453_v27  ;;  %v482_v42 = vshll.u32 %v423_v32, 16  ;;  %v488_v43 = vshll.u32 %v424_v34, 16  ;;  %v425_v58 = vld [vmem:[%s2282_s25 + $0x20] sm:$0xf]  ;;  %v426_v61 = vld [vmem:[%s2282_s25 + $0x24] sm:$0x1] }
  0x18   : > { %v467_v45 = vrot.slane %v465_v35, 4  ;;  %v470_v46 = vrot.slane %v468_v36, 5  ;;  %v476_v47 = vrot.slane %v474_v37, 5  ;;  %v481_v49 = vrot.slane %v479_v41, 4  ;;  %v427_v62 = vld [vmem:[%s2282_s25 + $0x28] sm:$0xf] }
  0x19   : > { %2092 = vmatpush3.bf16.msra.mxu0 %v2195_v5  ;;  %2080 = vmatpush3.bf16.msra.mxu1 %v2194_v7  ;;  %v444_v44 = vrot.slane %v443_v33, 4  ;;  %v458_v48 = vrot.slane %v457_v40, 4  ;;  %v484_v50 = vrot.slane %v482_v42, 5  ;;  %v490_v51 = vrot.slane %v488_v43, 5  ;;  %v428_v1 = vld [vmem:[%s2282_s25 + $0x2c] sm:$0x1] }
  0x1a   : > { %2113 = vmatprep.subr.bf16.mxu0 %v2311_v23  ;;  %2101 = vmatprep.subr.bf16.mxu1 %v2198_v22  ;;  %v471_v53 = vor.u32 %v470_v46, %v467_v45  ;;  %v493_v63 = vshrl.u32 %v425_v58, 16  ;;  %v496_v2 = vshll.u32 %v425_v58, 16  ;;  %v502_v3 = vshll.u32 %v426_v61, 16  ;;  %v2207_v9 = vld [vmem:[%s2579_s1 + $0x58] sm:$0xff]   ;;  %v429_v18 = vld [vmem:[%s2282_s25 + $0x30] sm:$0xf] }
  0x1b   : > { %v449_v52 = vsel %vm2323_vm3, %v444_v44, %v448_v26  ;;  %v463_v55 = vsel %vm2323_vm3, %v458_v48, %v462_v30  ;;  %v485_v56 = vor.u32 %v484_v50, %v481_v49  ;;  %v507_v4 = vshrl.u32 %v427_v62, 16  ;;  %v430_v19 = vld [vmem:[%s2282_s25 + $0x34] sm:$0x1]  ;;  %v431_v21 = vld [vmem:[%s2282_s25 + $0x38] sm:$0xf]  ;;  %v2359_v30 = vld [vmem:[%s2579_s1 + $0x68] sm:$0xff]  }
  0x1c   : > { %2082 = vmatmul.mubr.msk.bf16.vlgmr.msra.gmra.mxu1 %vm230_vm0, %v2197_v14  ;;  %v1833_v59 = vcombine.low %v449_v52, %v463_v55  ;;  %v472_v60 = vrot.slane %v471_v53, 4  ;;  %v495_v6 = vrot.slane %v493_v63, 4  ;;  %v510_v7 = vshll.u32 %v427_v62, 16  ;;  %v2203_v14 = vld [vmem:[%s2579_s1 + $0x40] sm:$0xff]   ;;  %v2210_v55 = vld [vmem:[%s2282_s25 + $0xb0] ss:$8 sps:$4 sm:$0xff]  }
  0x1d   : > { %2102 = vmatpush3.bf16.msra.mxu1 %v2198_v22  ;;  %2085 = vmatprep.mubr.msk.bf16.mxu1 %vm230_vm0, %v2200_v54  ;;  %v486_v0 = vrot.slane %v485_v56, 4  ;;  %v516_v8 = vshll.u32 %v428_v1, 16  ;;  %v498_v11 = vrot.slane %v496_v2, 5  ;;  %v504_v12 = vrot.slane %v502_v3, 5  ;;  %v432_v22 = vld [vmem:[%s2282_s25 + $0x3c] sm:$0x1] }
  0x1e   : > { %2103 = vmatprep.subr.bf16.mxu1 %v2202_v38  ;;  %2093 = vmatprep.mubr.msk.bf16.mxu0 %vm230_vm0, %v1833_v59  ;;  %v477_v5 = vsel %vm2323_vm3, %v472_v60, %v476_v47  ;;  %v509_v13 = vrot.slane %v507_v4, 4  ;;  %v512_v16 = vrot.slane %v510_v7, 5  ;;  %v521_v24 = vshrl.u32 %v429_v18, 16  ;;  %v2205_v46 = vld [vmem:[%s2282_s25 + $0xa0] ss:$8 sps:$4 sm:$0xff]  }
  0x1f   : > { %v491_v10 = vsel %vm2323_vm3, %v486_v0, %v490_v51  ;;  %v518_v17 = vrot.slane %v516_v8, 5  ;;  %v499_v20 = vor.u32 %v498_v11, %v495_v6  ;;  %v524_v25 = vshll.u32 %v429_v18, 16  ;;  %v2380_v51 = vld [vmem:[%s2579_s1 + $0x78] sm:$0xff]   ;;  %v2211_v56 = vld [vmem:[%s2282_s25 + $0xc0] ss:$8 sps:$4 sm:$0xff]  }
  0x20   : > { %v1834_v15 = vcombine.low %v477_v5, %v491_v10  ;;  %v513_v26 = vor.u32 %v512_v16, %v509_v13  ;;  %v530_v27 = vshll.u32 %v430_v19, 16  ;;  %v535_v28 = vshrl.u32 %v431_v21, 16  ;;  %v2206_v53 = vld [vmem:[%s2282_s25 + $0xd8] ss:$8 sps:$4 sm:$0xff]   ;;  %v1887_v59 = vld [vmem:[%s2282_s25 + $0x90] sm:$0xf] }
  0x21   : > { %2104 = vmatpush3.bf16.msra.mxu1 %v2202_v38  ;;  %v538_v29 = vshll.u32 %v431_v21, 16  ;;  %v500_v31 = vrot.slane %v499_v20, 4  ;;  %v523_v32 = vrot.slane %v521_v24, 4  ;;  %v526_v33 = vrot.slane %v524_v25, 5  ;;  %v2213_v38 = vld [vmem:[%s2579_s1 + $0x50] sm:$0xff]   ;;  %v2215_v61 = vld [vmem:[%s2579_s1 + $0x60] sm:$0xff]  }
  0x22   : > { %2125 = vmatprep.subr.bf16.mxu1 %v2207_v9  ;;  %2094 = vmatmul.mubr.msk.bf16.vlgmr.msra.gmra.mxu0 %vm230_vm0, %v1834_v15  ;;  %v544_v34 = vshll.u32 %v432_v22, 16  ;;  %v514_v35 = vrot.slane %v513_v26, 4  ;;  %v537_v36 = vrot.slane %v535_v28, 4  ;;  %v532_v42 = vrot.slane %v530_v27, 5  ;;  %v2212_v58 = vld [vmem:[%s2282_s25 + $0xf8] ss:$8 sps:$4 sm:$0xff]  }
  0x23   : > { %2114 = vmatpush3.bf16.msra.mxu0 %v2311_v23  ;;  %v540_v37 = vrot.slane %v538_v29, 5  ;;  %v505_v40 = vsel %vm2323_vm3, %v500_v31, %v504_v12  ;;  %v527_v41 = vor.u32 %v526_v33, %v523_v32  ;;  %v2204_v23 = vld [vmem:[%s2282_s25 + $0x90] ss:$8 sps:$4 sm:$0xff]   ;;  %v1888_v60 = vld [vmem:[%s2282_s25 + $0x94] sm:$0x1]  ;;  %v941_v0 = vshrl.u32 %v1887_v59, 16 }
  0x24   : > { %2086 = vmatmul.mubr.msk.bf16.gmra.mxu1 %vm230_vm0, %v2201_v57  ;;  %2115 = vmatprep.subr.bf16.mxu0 %v2203_v14  ;;  %v546_v43 = vrot.slane %v544_v34, 5  ;;  %v519_v44 = vsel %vm2323_vm3, %v514_v35, %v518_v17  ;;  %v2208_v57 = vld [vmem:[%s2282_s25 + $0xe8] ss:$8 sps:$4 sm:$0xff]   ;;  %v1889_v62 = vld [vmem:[%s2282_s25 + $0x98] sm:$0xf]  ;;  %v944_v1 = vshll.u32 %v1887_v59, 16 }
  0x25   : > { %v541_v45 = vor.u32 %v540_v37, %v537_v36  ;;  %v1835_v47 = vcombine.low %v505_v40, %v519_v44  ;;  %v528_v48 = vrot.slane %v527_v41, 4  ;;  %2105 = vmatprep.mubr.msk.bf16.mxu1 %vm230_vm0, %v2204_v23  ;;  %v1890_v63 = vld [vmem:[%s2282_s25 + $0x9c] sm:$0x1]  ;;  %v950_v2 = vshll.u32 %v1888_v60, 16  ;;  %v1891_v6 = vld [vmem:[%s2282_s25 + $0xa0] sm:$0xf] }
  0x26   : > { %v955_v3 = vshrl.u32 %v1889_v62, 16  ;;  %v958_v4 = vshll.u32 %v1889_v62, 16  ;;  %v964_v5 = vshll.u32 %v1890_v63, 16  ;;  %v943_v7 = vrot.slane %v941_v0, 4  ;;  %v1893_v10 = vld [vmem:[%s2282_s25 + $0xa8] sm:$0xf] }
  0x27   : > { %2116 = vmatpush3.bf16.msra.mxu0 %v2203_v14  ;;  %v542_v49 = vrot.slane %v541_v45, 4  ;;  %2097 = vmatprep.mubr.msk.bf16.mxu0 %vm230_vm0, %v1835_v47  ;;  %v533_v50 = vsel %vm2323_vm3, %v528_v48, %v532_v42  ;;  %v946_v8 = vrot.slane %v944_v1, 5  ;;  %v952_v11 = vrot.slane %v950_v2, 5  ;;  %v1894_v15 = vld [vmem:[%s2282_s25 + $0xac] sm:$0x1]  ;;  %v2221_v1 = vld [vmem:[%s2579_s1 + $0x70] sm:$0xff]  }
  0x28   : > { %2137 = vmatprep.subr.bf16.mxu0 %v2359_v30  ;;  %v957_v12 = vrot.slane %v955_v3, 4  ;;  %v960_v13 = vrot.slane %v958_v4, 5  ;;  %v966_v14 = vrot.slane %v964_v5, 5  ;;  %v969_v17 = vshrl.u32 %v1891_v6, 16  ;;  %v2214_v25 = vld [vmem:[%s2282_s25 + $0x108] ss:$8 sps:$4 sm:$0xff]  }
  0x29   : > { %v547_v52 = vsel %vm2323_vm3, %v542_v49, %v546_v43  ;;  %v947_v16 = vor.u32 %v946_v8, %v943_v7  ;;  %v972_v18 = vshll.u32 %v1891_v6, 16  ;;  %v983_v21 = vshrl.u32 %v1893_v10, 16  ;;  %v2412_v29 = vld [vmem:[%s2579_s1 + $0x88] sm:$0xff]   ;;  %v1895_v43 = vld [vmem:[%s2282_s25 + $0xb0] sm:$0xf] }
  0x2a   : > { %v1836_v54 = vcombine.low %v533_v50, %v547_v52  ;;  %v961_v20 = vor.u32 %v960_v13, %v957_v12  ;;  %v986_v22 = vshll.u32 %v1893_v10, 16  ;;  %v992_v24 = vshll.u32 %v1894_v15, 16  ;;  %v2216_v34 = vld [vmem:[%s2282_s25 + $0x8] ss:$8 sps:$4 sm:$0xff]   ;;  %v1896_v23 = vld [vmem:[%s2282_s25 + $0xb4] sm:$0x1] }
  0x2b   : > { %v948_v26 = vrot.slane %v947_v16, 4  ;;  %v971_v27 = vrot.slane %v969_v17, 4  ;;  %v974_v28 = vrot.slane %v972_v18, 5  ;;  %v985_v32 = vrot.slane %v983_v21, 4  ;;  %v1897_v45 = vld [vmem:[%s2282_s25 + $0xb8] sm:$0xf] }
  0x2c   : > { %2106 = vmatmul.mubr.msk.bf16.vlgmr.msra.gmra.mxu1 %vm230_vm0, %v2205_v46  ;;  %2098 = vmatmul.mubr.msk.bf16.gmra.mxu0 %vm230_vm0, %v1836_v54  ;;  %v988_v33 = vrot.slane %v986_v22, 5  ;;  %v994_v40 = vrot.slane %v992_v24, 5  ;;  %v1898_v46 = vld [vmem:[%s2282_s25 + $0xbc] sm:$0x1]  ;;  %v997_v47 = vshrl.u32 %v1895_v43, 16  ;;  %v1000_v49 = vshll.u32 %v1895_v43, 16 }
  0x2d   : > { %2126 = vmatpush3.bf16.msra.mxu1 %v2207_v9  ;;  %2109 = vmatprep.mubr.msk.bf16.mxu1 %vm230_vm0, %v2210_v55  ;;  %v1892_v9 = vld [vmem:[%s2282_s25 + $0xa4] sm:$0x1]  ;;  %v953_v35 = vsel %vm2323_vm3, %v948_v26, %v952_v11  ;;  %v975_v36 = vor.u32 %v974_v28, %v971_v27  ;;  %v1006_v50 = vshll.u32 %v1896_v23, 16  ;;  %v1011_v52 = vshrl.u32 %v1897_v45, 16  ;;  %v2218_v60 = vld [vmem:[%s2282_s25 + $0x18] ss:$8 sps:$4 sm:$0xff]  }
  0x2e   : > { %2127 = vmatprep.subr.bf16.mxu1 %v2213_v38  ;;  %2117 = vmatprep.mubr.msk.bf16.mxu0 %vm230_vm0, %v2206_v53  ;;  %v978_v19 = vshll.u32 %v1892_v9, 16  ;;  %v1899_v53 = vld [vmem:[%s2282_s25 + $0xc0] sm:$0xf]  ;;  %v999_v55 = vrot.slane %v997_v47, 4  ;;  %v1901_v0 = vld [vmem:[%s2282_s25 + $0xc8] sm:$0xf] }
  0x2f   : > { %v976_v42 = vrot.slane %v975_v36, 4  ;;  %v1008_v62 = vrot.slane %v1006_v50, 5  ;;  %v1013_v63 = vrot.slane %v1011_v52, 4  ;;  %v1902_v4 = vld [vmem:[%s2282_s25 + $0xcc] sm:$0x1]  ;;  %v1025_v5 = vshrl.u32 %v1899_v53, 16 }
  0x30   : > { %v980_v31 = vrot.slane %v978_v19, 5  ;;  %v1028_v6 = vshll.u32 %v1899_v53, 16  ;;  %v1039_v9 = vshrl.u32 %v1901_v0, 16  ;;  %v1042_v10 = vshll.u32 %v1901_v0, 16  ;;  %v2220_v18 = vld [vmem:[%s2282_s25 + $0x28] ss:$8 sps:$4 sm:$0xff]  }
  0x31   : > { %2128 = vmatpush3.bf16.msra.mxu1 %v2213_v38  ;;  %v989_v38 = vor.u32 %v988_v33, %v985_v32  ;;  %v1027_v12 = vrot.slane %v1025_v5, 4  ;;  %v2223_v19 = vld [vmem:[%s2579_s1 + $0x80] sm:$0xff]   ;;  %v2224_v33 = vld [vmem:[%s2282_s25 + $0x50] ss:$8 sps:$4 sm:$0xff]  }
  0x32   : > { %2149 = vmatprep.subr.bf16.mxu1 %v2380_v51  ;;  %v981_v48 = vsel %vm2323_vm3, %v976_v42, %v980_v31  ;;  %v1030_v13 = vrot.slane %v1028_v6, 5  ;;  %v1041_v16 = vrot.slane %v1039_v9, 4  ;;  %v1044_v17 = vrot.slane %v1042_v10, 5  ;;  %v2222_v32 = vld [vmem:[%s2282_s25 + $0x38] ss:$8 sps:$4 sm:$0xff]  }
  0x33   : > { %v990_v44 = vrot.slane %v989_v38, 4  ;;  %v1964_v38 = vld [vmem:[%s2282_s25 + $0x14] sm:$0x1] }
  0x34   : > { %2110 = vmatmul.mubr.msk.bf16.gmra.mxu1 %vm230_vm0, %v2211_v56  ;;  %2118 = vmatmul.mubr.msk.bf16.vlgmr.msra.gmra.mxu0 %vm230_vm0, %v2208_v57  ;;  %v1014_v56 = vshll.u32 %v1897_v45, 16  ;;  %v1020_v57 = vshll.u32 %v1898_v46, 16  ;;  %v1031_v21 = vor.u32 %v1030_v13, %v1027_v12  ;;  %v1045_v24 = vor.u32 %v1044_v17, %v1041_v16  ;;  %v1965_v45 = vld [vmem:[%s2282_s25 + $0x18] sm:$0xf]  ;;  %v1969_v12 = vld [vmem:[%s2282_s25 + $0x28] sm:$0xf] }
  0x35   : > { %2138 = vmatpush3.bf16.msra.mxu0 %v2359_v30  ;;  %2121 = vmatprep.mubr.msk.bf16.mxu0 %vm230_vm0, %v2212_v58  ;;  %v962_v30 = vrot.slane %v961_v20, 4  ;;  %v995_v54 = vsel %vm2323_vm3, %v990_v44, %v994_v40  ;;  %v1900_v58 = vld [vmem:[%s2282_s25 + $0xc4] sm:$0x1]  ;;  %v1468_v44 = vshll.u32 %v1964_v38, 16  ;;  %v1971_v16 = vld [vmem:[%s2282_s25 + $0x30] sm:$0xf] }
  0x36   : > { %2139 = vmatprep.subr.bf16.mxu0 %v2215_v61  ;;  %v1908_v59 = vcombine.low %v981_v48, %v995_v54  ;;  %v1016_v2 = vrot.slane %v1014_v56, 5  ;;  %v1022_v3 = vrot.slane %v1020_v57, 5  ;;  %v1034_v8 = vshll.u32 %v1900_v58, 16  ;;  %v1966_v48 = vld [vmem:[%s2282_s25 + $0x1c] sm:$0x1] }
  0x37   : > { %v967_v37 = vsel %vm2323_vm3, %v962_v30, %v966_v14  ;;  %v1048_v14 = vshll.u32 %v1902_v4, 16  ;;  %v1032_v27 = vrot.slane %v1031_v21, 4  ;;  %v1046_v30 = vrot.slane %v1045_v24, 4  ;;  %v2225_v56 = vld [vmem:[%s2282_s25 + $0x60] ss:$8 sps:$4 sm:$0xff]  }
  0x38   : > { %v1907_v41 = vcombine.low %v953_v35, %v967_v37  ;;  %v1017_v11 = vor.u32 %v1016_v2, %v1013_v63  ;;  %v1036_v22 = vrot.slane %v1034_v8, 5  ;;  %v1962_v35 = vld [vmem:[%s2282_s25 + $0xc] sm:$0x1]  ;;  %v1963_v37 = vld [vmem:[%s2282_s25 + $0x10] sm:$0xf]  ;;  %v1470_v54 = vrot.slane %v1468_v44, 5 }
  0x39   : > { %2140 = vmatpush3.bf16.msra.mxu0 %v2215_v61  ;;  %v1002_v61 = vrot.slane %v1000_v49, 5  ;;  %v1454_v42 = vshll.u32 %v1962_v35, 16  ;;  %v1459_v43 = vshrl.u32 %v1963_v37, 16  ;;  %v1462_v23 = vshll.u32 %v1963_v37, 16  ;;  %v1967_v49 = vld [vmem:[%s2282_s25 + $0x20] sm:$0xf] }
  0x3a   : > { %2161 = vmatprep.subr.bf16.mxu0 %v2412_v29  ;;  %2129 = vmatprep.mubr.msk.bf16.mxu1 %vm230_vm0, %v1907_v41  ;;  %v1018_v20 = vrot.slane %v1017_v11, 4  ;;  %v1037_v31 = vsel %vm2323_vm3, %v1032_v27, %v1036_v22  ;;  %v1473_v58 = vshrl.u32 %v1965_v45, 16  ;;  %v1490_v63 = vshll.u32 %v1967_v49, 16  ;;  %v2226_v4 = vld [vmem:[%s2282_s25 + $0x70] ss:$8 sps:$4 sm:$0xff]  }
  0x3b   : > { %v1003_v7 = vor.u32 %v1002_v61, %v999_v55  ;;  %v1456_v50 = vrot.slane %v1454_v42, 5  ;;  %v1461_v52 = vrot.slane %v1459_v43, 4  ;;  %v1464_v53 = vrot.slane %v1462_v23, 5  ;;  %v1968_v55 = vld [vmem:[%s2282_s25 + $0x24] sm:$0x1] }
  0x3c   : > { %2122 = vmatmul.mubr.msk.bf16.gmra.mxu0 %vm230_vm0, %v2214_v25  ;;  %2130 = vmatmul.mubr.msk.bf16.vlgmr.msra.gmra.mxu1 %vm230_vm0, %v1908_v59  ;;  %v1050_v25 = vrot.slane %v1048_v14, 5  ;;  %v1023_v26 = vsel %vm2323_vm3, %v1018_v20, %v1022_v3  ;;  %v1476_v59 = vshll.u32 %v1965_v45, 16  ;;  %v1496_v0 = vshll.u32 %v1968_v55, 16  ;;  %v1972_v17 = vld [vmem:[%s2282_s25 + $0x34] sm:$0x1] }
  0x3d   : > { %2141 = vmatprep.mubr.msk.bf16.mxu0 %vm230_vm0, %v2216_v34  ;;  %2150 = vmatpush3.bf16.msra.mxu1 %v2380_v51  ;;  %v1004_v15 = vrot.slane %v1003_v7, 4  ;;  %v1961_v34 = vld [vmem:[%s2282_s25 + $0x8] sm:$0xf]  ;;  %v1465_v61 = vor.u32 %v1464_v53, %v1461_v52  ;;  %v1475_v2 = vrot.slane %v1473_v58, 4  ;;  %v1492_v7 = vrot.slane %v1490_v63, 5 }
  0x3e   : > { %2151 = vmatprep.subr.bf16.mxu1 %v2221_v1  ;;  %v1445_v40 = vshrl.u32 %v1961_v34, 16  ;;  %v1448_v41 = vshll.u32 %v1961_v34, 16  ;;  %v1478_v3 = vrot.slane %v1476_v59, 5  ;;  %v1498_v11 = vrot.slane %v1496_v0, 5  ;;  %v1973_v22 = vld [vmem:[%s2282_s25 + $0x38] sm:$0xf] }
  0x3f   : > { %v1009_v51 = vsel %vm2323_vm3, %v1004_v15, %v1008_v62  ;;  %v1487_v62 = vshrl.u32 %v1967_v49, 16  ;;  %v1466_v5 = vrot.slane %v1465_v61, 4  ;;  %v1970_v15 = vld [vmem:[%s2282_s25 + $0x2c] sm:$0x1]  ;;  %v1501_v20 = vshrl.u32 %v1969_v12, 16 }
  0x40   : > { %v1909_v28 = vcombine.low %v1009_v51, %v1023_v26  ;;  %v1447_v46 = vrot.slane %v1445_v40, 4  ;;  %v1450_v47 = vrot.slane %v1448_v41, 5  ;;  %v1479_v9 = vor.u32 %v1478_v3, %v1475_v2  ;;  %v1974_v27 = vld [vmem:[%s2282_s25 + $0x3c] sm:$0x1]  ;;  %v1976_v37 = vld [vmem:[%s2282_s25 + $0x44] sm:$0x1] }
  0x41   : > { %2152 = vmatpush3.bf16.msra.mxu1 %v2221_v1  ;;  %v1489_v6 = vrot.slane %v1487_v62, 4  ;;  %v1471_v13 = vsel %vm2323_vm3, %v1466_v5, %v1470_v54  ;;  %v1504_v21 = vshll.u32 %v1969_v12, 16  ;;  %v1510_v24 = vshll.u32 %v1970_v15, 16  ;;  %v2227_v40 = vld [vmem:[%s2282_s25 + $0x80] ss:$8 sps:$4 sm:$0xff]  }
  0x42   : > { %2133 = vmatprep.mubr.msk.bf16.mxu1 %vm230_vm0, %v1909_v28  ;;  %v1451_v57 = vor.u32 %v1450_v47, %v1447_v46  ;;  %v1518_v26 = vshll.u32 %v1971_v16, 16  ;;  %v1529_v43 = vshrl.u32 %v1973_v22, 16  ;;  %v1532_v44 = vshll.u32 %v1973_v22, 16 }
  0x43   : > { %v1493_v14 = vor.u32 %v1492_v7, %v1489_v6  ;;  %v1512_v34 = vrot.slane %v1510_v24, 5  ;;  %v1538_v45 = vshll.u32 %v1974_v27, 16 }
  0x44   : > { %2142 = vmatmul.mubr.msk.bf16.vlgmr.msra.gmra.mxu0 %vm230_vm0, %v2218_v60  ;;  %v1482_v60 = vshll.u32 %v1966_v48, 16  ;;  %v1452_v1 = vrot.slane %v1451_v57, 4  ;;  %v1531_v48 = vrot.slane %v1529_v43, 4  ;;  %v1534_v53 = vrot.slane %v1532_v44, 5 }
  0x45   : > { %2162 = vmatpush3.bf16.msra.mxu0 %v2412_v29  ;;  %2145 = vmatprep.mubr.msk.bf16.mxu0 %vm230_vm0, %v2220_v18  ;;  %v1051_v29 = vsel %vm2323_vm3, %v1046_v30, %v1050_v25  ;;  %v1494_v51 = vrot.slane %v1493_v14, 4  ;;  %v1515_v25 = vshrl.u32 %v1971_v16, 16  ;;  %v1503_v30 = vrot.slane %v1501_v20, 4 }
  0x46   : > { %2163 = vmatprep.subr.bf16.mxu0 %v2223_v19  ;;  %v1910_v36 = vcombine.low %v1037_v31, %v1051_v29  ;;  %v1457_v8 = vsel %vm2323_vm3, %v1452_v1, %v1456_v50  ;;  %v1484_v10 = vrot.slane %v1482_v60, 5  ;;  %v1506_v31 = vrot.slane %v1504_v21, 5  ;;  %v1975_v29 = vld [vmem:[%s2282_s25 + $0x40] sm:$0xf] }
  0x47   : > { %v1981_v18 = vcombine.low %v1457_v8, %v1471_v13  ;;  %v1517_v35 = vrot.slane %v1515_v25, 4  ;;  %v1543_v46 = vshrl.u32 %v1975_v29, 16  ;;  %v1546_v49 = vshll.u32 %v1975_v29, 16 }
  0x48   : > { %2134 = vmatmul.mubr.msk.bf16.gmra.mxu1 %vm230_vm0, %v1910_v36  ;;  %v1520_v36 = vrot.slane %v1518_v26, 5  ;;  %v1507_v41 = vor.u32 %v1506_v31, %v1503_v30  ;;  %v1552_v50 = vshll.u32 %v1976_v37, 16  ;;  %v1535_v58 = vor.u32 %v1534_v53, %v1531_v48 }
  0x49   : > { %2164 = vmatpush3.bf16.msra.mxu0 %v2223_v19  ;;  %2153 = vmatprep.mubr.msk.bf16.mxu1 %vm230_vm0, %v2224_v33  ;;  %v1480_v19 = vrot.slane %v1479_v9, 4  ;;  %v1499_v33 = vsel %vm2323_vm3, %v1494_v51, %v1498_v11  ;;  %v1545_v54 = vrot.slane %v1543_v46, 4  ;;  %v1540_v59 = vrot.slane %v1538_v45, 5 }
  0x4a   : > { %v1521_v23 = vor.u32 %v1520_v36, %v1517_v35  ;;  %v1508_v47 = vrot.slane %v1507_v41, 4  ;;  %v1554_v62 = vrot.slane %v1552_v50, 5  ;;  %v1536_v63 = vrot.slane %v1535_v58, 4 }
  0x4b   : > { %v1485_v28 = vsel %vm2323_vm3, %v1480_v19, %v1484_v10 }
  0x4c   : > { %2146 = vmatmul.mubr.msk.bf16.gmra.mxu0 %vm230_vm0, %v2222_v32  ;;  %v1524_v32 = vshll.u32 %v1972_v17, 16  ;;  %v1982_v38 = vcombine.low %v1485_v28, %v1499_v33  ;;  %v1522_v52 = vrot.slane %v1521_v23, 4  ;;  %v1513_v55 = vsel %vm2323_vm3, %v1508_v47, %v1512_v34 }
  0x4d   : > { %2165 = vmatprep.mubr.msk.bf16.mxu0 %vm230_vm0, %v1981_v18  ;;  %v1541_v1 = vsel %vm2323_vm3, %v1536_v63, %v1540_v59 }
  0x4e   : > { %v1526_v42 = vrot.slane %v1524_v32, 5 }
  0x50   : > { %2154 = vmatmul.mubr.msk.bf16.vlgmr.msra.gmra.mxu1 %vm230_vm0, %v2225_v56  ;;  %v1548_v56 = vrot.slane %v1546_v49, 5  ;;  %v1527_v57 = vsel %vm2323_vm3, %v1522_v52, %v1526_v42 }
  0x51   : > { %2157 = vmatprep.mubr.msk.bf16.mxu1 %vm230_vm0, %v2226_v4  ;;  %v1983_v60 = vcombine.low %v1513_v55, %v1527_v57 }
  0x52   : > { %v1549_v61 = vor.u32 %v1548_v56, %v1545_v54 }
  0x54   : > { %2166 = vmatmul.mubr.msk.bf16.vlgmr.msra.gmra.mxu0 %vm230_vm0, %v1982_v38  ;;  %v1550_v0 = vrot.slane %v1549_v61, 4 }
  0x55   : > { %2169 = vmatprep.mubr.msk.bf16.mxu0 %vm230_vm0, %v1983_v60 }
  0x56   : > { %v1555_v2 = vsel %vm2323_vm3, %v1550_v0, %v1554_v62 }
  0x57   : > { %v1984_v3 = vcombine.low %v1541_v1, %v1555_v2 }
  0x58   : > { %2158 = vmatmul.mubr.msk.bf16.gmra.mxu1 %vm230_vm0, %v2227_v40 }
  0x5c   : > { %2170 = vmatmul.mubr.msk.bf16.gmra.mxu0 %vm230_vm0, %v1984_v3 }
  0xd4   : > { %v2504_v4 = vpop.f32.mrf.mxu1  ;;  %v2071_v6 = vpop.f32.mrf.mxu0 }
  0xd6   : > { %v2506_v5 = vpop.f32.mrf.mxu1  ;;  %v277_v9 = vpop.f32.mrf.mxu0 }
  0xd8   : > { %v2508_v7 = vpop.f32.mrf.mxu1  ;;  %v2072_v12 = vpop.f32.mrf.mxu0 }
  0xda   : > { %v2510_v8 = vpop.f32.mrf.mxu1  ;;  %v280_v39 = vpop.f32.mrf.mxu0 }
  0xdc   : > { %v2083_v10 = vpop.f32.mrf.mxu1 }
  0xdd   : > { %v395_v45 = vadd.f32 %v2083_v10, %v2071_v6 }
  0xde   : > { %v386_v11 = vpop.f32.mrf.mxu1 }
  0xdf   : > { %v387_v48 = vadd.f32 %v386_v11, %v277_v9 }
  0xe0   : > { %v2084_v13 = vpop.f32.mrf.mxu1 }
  0xe1   : > { %v398_v53 = vadd.f32 %v2084_v13, %v2072_v12 }
  0xe2   : > { %v389_v14 = vpop.f32.mrf.mxu1  ;;  %v2095_v16 = vpop.f32.mrf.mxu0 }
  0xe3   : > { %v656_v52 = vadd.f32 %v2095_v16, %v395_v45  ;;  %v390_v56 = vadd.f32 %v389_v14, %v280_v39 }
  0xe4   : > { %v2087_v15 = vpop.f32.mrf.mxu1  ;;  %v623_v18 = vpop.f32.mrf.mxu0 }
  0xe5   : > { %v654_v55 = vadd.f32 %v623_v18, %v387_v48  ;;  %v411_v6 = vadd.f32 %v2087_v15, %v2504_v4 }
  0xe6   : > { %v402_v17 = vpop.f32.mrf.mxu1  ;;  %v2096_v20 = vpop.f32.mrf.mxu0 }
  0xe7   : > { %v657_v60 = vadd.f32 %v2096_v20, %v398_v53  ;;  %v403_v13 = vadd.f32 %v402_v17, %v2506_v5 }
  0xe8   : > { %v2088_v19 = vpop.f32.mrf.mxu1  ;;  %v626_v51 = vpop.f32.mrf.mxu0 }
  0xe9   : > { %v655_v0 = vadd.f32 %v626_v51, %v390_v56 }
  0xea   : > { %v2512_v21 = vpop.f32.mrf.mxu1 }
  0xeb   : > { %v406_v4 = vadd.f32 %v2512_v21, %v2510_v8  ;;  %v2537_v8 = vld [vmem:[%s2580_s2] ss:$0 sm:$0xff] }
  0xec   : > { %v2107_v22 = vpop.f32.mrf.mxu1  ;;  %v2099_v26 = vpop.f32.mrf.mxu0 }
  0xed   : > { %v787_v57 = vadd.f32 %v2107_v22, %v656_v52  ;;  %v660_v20 = vadd.f32 %v2099_v26, %v411_v6  ;;  %v414_v22 = vadd.f32 %v2088_v19, %v2508_v7 }
  0xee   : > { %v754_v24 = vpop.f32.mrf.mxu1  ;;  %v639_v28 = vpop.f32.mrf.mxu0 }
  0xef   : > { %v785_v61 = vadd.f32 %v754_v24, %v654_v55  ;;  %v658_v45 = vadd.f32 %v639_v28, %v403_v13 }
  0xf0   : > { %v2108_v25 = vpop.f32.mrf.mxu1  ;;  %v2100_v30 = vpop.f32.mrf.mxu0 }
  0xf1   : > { %v788_v2 = vadd.f32 %v2108_v25, %v657_v60  ;;  %v661_v48 = vadd.f32 %v2100_v30, %v414_v22 }
  0xf2   : > { %v757_v27 = vpop.f32.mrf.mxu1  ;;  %v2514_v32 = vpop.f32.mrf.mxu0 }
  0xf3   : > { %v786_v11 = vadd.f32 %v757_v27, %v655_v0  ;;  %v659_v19 = vadd.f32 %v2514_v32, %v406_v4 }
  0xf4   : > { %v2111_v31 = vpop.f32.mrf.mxu1  ;;  %v2119_v29 = vpop.f32.mrf.mxu0 }
  0xf5   : > { %v918_v1 = vadd.f32 %v2119_v29, %v787_v57  ;;  %v791_v15 = vadd.f32 %v2111_v31, %v660_v20 }
  0xf6   : > { %v770_v33 = vpop.f32.mrf.mxu1  ;;  %v885_v34 = vpop.f32.mrf.mxu0 }
  0xf7   : > { %v916_v10 = vadd.f32 %v885_v34, %v785_v61 }
  0xf8   : > { %v2120_v35 = vpop.f32.mrf.mxu0  ;;  %v2112_v36 = vpop.f32.mrf.mxu1 }
  0xf9   : > { %v919_v16 = vadd.f32 %v2120_v35, %v788_v2  ;;  %v789_v35 = vadd.f32 %v770_v33, %v658_v45 }
  0xfa   : > { %v888_v37 = vpop.f32.mrf.mxu0  ;;  %v2516_v40 = vpop.f32.mrf.mxu1 }
  0xfb   : > { %v917_v24 = vadd.f32 %v888_v37, %v786_v11  ;;  %v790_v33 = vadd.f32 %v2516_v40, %v659_v19 }
  0xfc   : > { %v2123_v38 = vpop.f32.mrf.mxu0  ;;  %v2131_v43 = vpop.f32.mrf.mxu1 }
  0xfd   : > { %v1160_v12 = vadd.f32 %v2131_v43, %v918_v1  ;;  %v922_v37 = vadd.f32 %v2123_v38, %v791_v15 }
  0xfe   : > { %v2518_v41 = vpop.f32.mrf.mxu0  ;;  %v1127_v44 = vpop.f32.mrf.mxu1 }
  0xff   : > { %v1158_v18 = vadd.f32 %v1127_v44, %v916_v10  ;;  %v920_v30 = vadd.f32 %v2518_v41, %v789_v35 }
 0x100   : > { %v2520_v42 = vpop.f32.mrf.mxu0  ;;  %v2132_v47 = vpop.f32.mrf.mxu1 }
 0x101   : > { %v1161_v29 = vadd.f32 %v2132_v47, %v919_v16 }
 0x102   : > { %v2522_v23 = vpop.f32.mrf.mxu0  ;;  %v1130_v50 = vpop.f32.mrf.mxu1 }
 0x103   : > { %v1159_v17 = vadd.f32 %v1130_v50, %v917_v24  ;;  %v921_v41 = vadd.f32 %v2522_v23, %v790_v33 }
 0x104   : > { %v2143_v46 = vpop.f32.mrf.mxu0 }
 0x105   : > { %v1291_v25 = vadd.f32 %v2143_v46, %v1160_v12  ;;  %v792_v46 = vadd.f32 %v2112_v36, %v661_v48 }
 0x106   : > { %v1258_v49 = vpop.f32.mrf.mxu0 }
 0x107   : > { %v1289_v5 = vadd.f32 %v1258_v49, %v1158_v18 }
 0x108   : > { %v2144_v54 = vpop.f32.mrf.mxu0  ;;  %v2135_v59 = vpop.f32.mrf.mxu1 }
 0x109   : > { %v1292_v26 = vadd.f32 %v2144_v54, %v1161_v29  ;;  %v1164_v50 = vadd.f32 %v2135_v59, %v922_v37  ;;  %v923_v54 = vadd.f32 %v2520_v42, %v792_v46 }
 0x10a   : > { %v1261_v58 = vpop.f32.mrf.mxu0  ;;  %v1143_v63 = vpop.f32.mrf.mxu1 }
 0x10b   : > { %v1290_v31 = vadd.f32 %v1261_v58, %v1159_v17  ;;  %v1162_v55 = vadd.f32 %v1143_v63, %v920_v30 }
 0x10c   : > { %v2147_v62 = vpop.f32.mrf.mxu0  ;;  %v2136_v9 = vpop.f32.mrf.mxu1 }
 0x10d   : > { %v1295_v40 = vadd.f32 %v2147_v62, %v1164_v50  ;;  %v1165_v59 = vadd.f32 %v2136_v9, %v923_v54 }
 0x10e   : > { %v2524_v3 = vpop.f32.mrf.mxu0  ;;  %v1146_v39 = vpop.f32.mrf.mxu1 }
 0x10f   : > { %v1293_v10 = vadd.f32 %v2524_v3, %v1162_v55  ;;  %v1163_v23 = vadd.f32 %v1146_v39, %v921_v41 }
 0x110   : > { %v2528_v14 = vpop.f32.mrf.mxu0  ;;  %v2155_v51 = vpop.f32.mrf.mxu1 }
 0x111   : > { %v1422_v43 = vadd.f32 %v2155_v51, %v1291_v25  ;;  %v1296_v13 = vadd.f32 %v2528_v14, %v1165_v59 }
 0x112   : > { %v1277_v27 = vpop.f32.mrf.mxu0  ;;  %v1389_v34 = vpop.f32.mrf.mxu1 }
 0x113   : > { %v1420_v7 = vadd.f32 %v1389_v34, %v1289_v5  ;;  %v1294_v3 = vadd.f32 %v1277_v27, %v1163_v23 }
 0x114   : > { %v2156_v44 = vpop.f32.mrf.mxu1  ;;  %v2167_v28 = vpop.f32.mrf.mxu0 }
 0x115   : > { %v1664_v47 = vadd.f32 %v2167_v28, %v1422_v43  ;;  %v1423_v49 = vadd.f32 %v2156_v44, %v1292_v26 }
 0x116   : > { %v1392_v21 = vpop.f32.mrf.mxu1  ;;  %v1631_v52 = vpop.f32.mrf.mxu0 }
 0x117   : > { %v1679_v32 = vadd.f32 %v2537_v8, %v1664_v47  ;;  %v1662_v36 = vadd.f32 %v1631_v52, %v1420_v7  ;;  %v1421_v38 = vadd.f32 %v1392_v21, %v1290_v31 }
 0x118   : > { %v2159_v53 = vpop.f32.mrf.mxu1  ;;  %v2168_v56 = vpop.f32.mrf.mxu0 }
 0x119   : > { %v1687_v58 = vmax.f32 %v1679_v32, 0.0  ;;  %v1677_v60 = vadd.f32 %v2537_v8, %v1662_v36  ;;  %v1665_v61 = vadd.f32 %v2168_v56, %v1423_v49  ;;  %v1426_v62 = vadd.f32 %v2159_v53, %v1295_v40 }
 0x11a   : > { %v1405_v57 = vpop.f32.mrf.mxu1  ;;  %v1634_v42 = vpop.f32.mrf.mxu0 }
 0x11b   : > { %v2005_v63 = vpack.c.bf16 %v1687_v58, %v1687_v58  ;;  %v1685_v0 = vmax.f32 %v1677_v60, 0.0  ;;  %v1680_v1 = vadd.f32 %v2537_v8, %v1665_v61  ;;  %v1663_v2 = vadd.f32 %v1634_v42, %v1421_v38 }
 0x11c   : > { %v2160_v6 = vpop.f32.mrf.mxu1  ;;  %v1424_v16 = vadd.f32 %v1405_v57, %v1293_v10  ;;  %v2171_v22 = vpop.f32.mrf.mxu0 }
 0x11d   : > { %1728 = vst.msk [vmem:[%s2549_s13 + $0x8] sm:$0xf] %vm1725_vm4, %v2005_v63  ;;  %v2003_v9 = vpack.c.bf16 %v1685_v0, %v1685_v0  ;;  %v1688_v11 = vmax.f32 %v1680_v1, 0.0  ;;  %v1678_v12 = vadd.f32 %v2537_v8, %v1663_v2  ;;  %v1668_v39 = vadd.f32 %v2171_v22, %v1426_v62 }
 0x11e   : > { %v1408_v51 = vpop.f32.mrf.mxu1  ;;  %v1427_v24 = vadd.f32 %v2160_v6, %v1296_v13  ;;  %v1647_v29 = vpop.f32.mrf.mxu0 }
 0x11f   : > { %1726 = vst.msk [vmem:[%s2549_s13] sm:$0xf] %vm1725_vm4, %v2003_v9  ;;  %v2006_v18 = vpack.c.bf16 %v1688_v11, %v1688_v11  ;;  %v1686_v20 = vmax.f32 %v1678_v12, 0.0  ;;  %v1683_v45 = vadd.f32 %v2537_v8, %v1668_v39  ;;  %v1666_v4 = vadd.f32 %v1647_v29, %v1424_v16 }
 0x120   : > { %v1425_v14 = vadd.f32 %v1408_v51, %v1294_v3  ;;  %v2172_v15 = vpop.f32.mrf.mxu0 }
 0x121   : > { %1729 = vst.msk [vmem:[%s2549_s13 + $0xc] sm:$0xf] %vm1725_vm4, %v2006_v18  ;;  %v2004_v25 = vpack.c.bf16 %v1686_v20, %v1686_v20  ;;  %v1691_v34 = vmax.f32 %v1683_v45, 0.0  ;;  %v1681_v5 = vadd.f32 %v2537_v8, %v1666_v4  ;;  %v1669_v27 = vadd.f32 %v2172_v15, %v1427_v24 }
 0x122   : > { %v1650_v17 = vpop.f32.mrf.mxu0 }
 0x123   : > { %1727 = vst.msk [vmem:[%s2549_s13 + $0x4] sm:$0xf] %vm1725_vm4, %v2004_v25  ;;  %v2009_v43 = vpack.c.bf16 %v1691_v34, %v1691_v34  ;;  %v1689_v48 = vmax.f32 %v1681_v5, 0.0  ;;  %v1684_v35 = vadd.f32 %v2537_v8, %v1669_v27  ;;  %v1667_v44 = vadd.f32 %v1650_v17, %v1425_v14 }
 0x125   : > { %1732 = vst.msk [vmem:[%s2549_s13 + $0x18] sm:$0xf] %vm1725_vm4, %v2009_v43  ;;  %v2007_v26 = vpack.c.bf16 %v1689_v48, %v1689_v48  ;;  %v1692_v7 = vmax.f32 %v1684_v35, 0.0  ;;  %v1682_v19 = vadd.f32 %v2537_v8, %v1667_v44 }
 0x127   : > { %1730 = vst.msk [vmem:[%s2549_s13 + $0x10] sm:$0xf] %vm1725_vm4, %v2007_v26  ;;  %v2010_v37 = vpack.c.bf16 %v1692_v7, %v1692_v7  ;;  %v1690_v46 = vmax.f32 %v1682_v19, 0.0 }
 0x129   : > { %1733 = vst.msk [vmem:[%s2549_s13 + $0x1c] sm:$0xf] %vm1725_vm4, %v2010_v37  ;;  %v2008_v28 = vpack.c.bf16 %v1690_v46, %v1690_v46 }
 0x12b   : > { %1731 = vst.msk [vmem:[%s2549_s13 + $0x14] sm:$0xf] %vm1725_vm4, %v2008_v28 }
 0x12c PF: > { %s13_s12 = sadd.s32 1, %s2234_s12  }
 0x12d   : > { %p10_p4 = scmp.ge.s32.totalorder %s13_s12, 4  }
 0x12f   :  { %12 = sbr.rel (!%p10_p4) target bundleno = 1 (0x1), region = 75 }

// kernel: _lambda_.9
= control target key start
LH: loop header
LB: loop body
LE: loop exit
PB: predicated region body
PF: predicated region fallthrough
CT: control target
= control target key end

     0   :  { %9 = vsyncpa [#allocation3], 0  ;;  %s928_s0 = inlined_call_operand.vmem [shape: f32[2,64,128], index: 0, kind: input, shape index: {}]   ;;  %s929_s1 = inlined_call_operand.vmem [shape: f32[2,1,128], index: 1, kind: input, shape index: {}]   ;;  %s930_s2 = inlined_call_operand.vmem [shape: f32[2,64,1], index: 2, kind: input, shape index: {}]   ;;  %s931_s3 = inlined_call_operand.vmem [shape: f32[2,64,128], index: 3, kind: input, shape index: {}]   ;;  %s932_s4 = inlined_call_operand.hbm [shape: f32[2,64,128], index: 4, kind: output, shape index: {}]  }
   0x1   :  { %11 = vsyncpa [#allocation3 + $0x1], 0  ;;  %s761_s15 = smov 0   ;;  %s763_s16 = smov 0  }
   0x2   :  { %s765_s17 = smov 0   ;;  %s767_s18 = smov 0  }
   0x3   :  { %s769_s19 = smov 0   ;;  %s771_s20 = smov 0  }
   0x4 LB: > { %s573_s21 = sadd.s32 4294967295, %s730_s20   ;;  %s574_s22 = sadd.s32 4294967294, %s730_s20   ;;  %s730_s20 = sphi %s771_s20, %s17_s20   ;;  %s726_s19 = sphi %s769_s19, %s939_s19   ;;  %s722_s18 = sphi %s767_s18, %s938_s18   ;;  %s718_s17 = sphi %s765_s17, %s937_s17   ;;  %s714_s16 = sphi %s763_s16, %s936_s16   ;;  %s710_s15 = sphi %s761_s15, %s935_s15  }
   0x5   : > { %s29_s23 = sadd.s32 1, %s726_s19  ;;  %s148_s24 = sadd.s32 1, %s718_s17 }
   0x6   : > { %p31_p0 = scmp.ge.s32.totalorder %s29_s23, 2  ;;  %p158_p1 = scmp.ne.s32.totalorder %s718_s17, %s714_s16 }
   0x7   : > { %p159_p2 = scmp.eq.s32.totalorder %s573_s21, 1  ;;  %p164_p3 = scmp.ne.s32.totalorder %s714_s16, %s710_s15 }
   0x8   : > { %s941_s23 = smov (%p31_p0, %s29_s23), 0  ;;  %p165_p5 = scmp.eq.s32.totalorder %s574_s22, 1 }
   0x9   : > { %p801_p4 = por %p159_p2, %p158_p1  ;;  %s143_s26 = ssub.s32 %s726_s19, %s941_s23 }
   0xa   : > { %p577_p6 = scmp.ge.s32.totalorder %s730_s20, 1  ;;  %p146_p7 = scmp.eq.s32.totalorder %s143_s26, 0 }
   0xb   : > { %p808_p8 = por %p165_p5, %p164_p3  ;;  %p228_p9 = scmp.lt.s32.totalorder %s730_s20, 3 }
   0xc   : > { %s814_s28 = scalar_select %p146_p7, %s718_s17, %s148_s24  }
   0xd   : > { %p229_p10 = pnand %p577_p6, %p228_p9 }
   0xe   : > { %p280_p11 = scmp.lt.s32.totalorder (!%p229_p10), %s722_s18, 1  ;;  %s276_s24 = sand.u32 (!%p229_p10), 1, %s714_s16  }
   0xf   : > { %232 = sbr.rel (%p229_p10) target bundleno = 185 (0xb9), region = 36  ;;  %s578_s26 = sshll.u32 (!%p229_p10), %s276_s24, 6 }
  0x14   : > { %v732_v0 = vmov 0   ;;  %s818_s29 = scalar_select %p280_p11, %s722_s18, 1  ;;  %v332_v17 = vlaneseq }
  0x15   : > { %653 = vset.pattern.permute.xlu1 %v732_v0  ;;  %652 = vset.pattern.permute.xlu0 %v732_v0 }
  0x16   : > { %s821_s30 = sshll.u32 %s818_s29, 6  ;;  %s291_s10 = scalar_lea.vmem %s929_s1, %s818_s29  ;;  %v333_v18 = vshrl.u32 %v332_v17, 7 }
  0x17   : > { %s300_s7 = scalar_lea.vmem %s930_s2, %s821_s30  ;;  %v313_v19 = vld [vmem:[%s291_s10] sm:$0x1]  ;;  %s835_s13 = scalar_lea.vmem %s928_s0, %s821_s30 }
  0x18   : > { %v317_v1 = vld [vmem:[%s300_s7 + $0x10] sm:$0xff]  ;;  %v315_v2 = vld [vmem:[%s300_s7] sm:$0xff]  ;;  %v318_v3 = vld [vmem:[%s300_s7 + $0x18] sm:$0xff]  ;;  %v314_v20 = vmul.f32 0.3333333, %v313_v19  ;;  %v334_v21 = vsub.s32 0, %v333_v18  ;;  %s841_s22 = scalar_lea.vmem %s931_s3, %s821_s30 }
  0x19   : > { %v325_v4 = vmul.f32 0.666666, %v317_v1  ;;  %v323_v5 = vmul.f32 0.666666, %v315_v2  ;;  %v316_v6 = vld [vmem:[%s300_s7 + $0x8] sm:$0xff]  ;;  %v319_v10 = vld [vmem:[%s300_s7 + $0x20] sm:$0xff] }
  0x1a   : > { %v326_v7 = vmul.f32 0.666666, %v318_v3  ;;  %v324_v8 = vmul.f32 0.666666, %v316_v6  ;;  %v320_v9 = vld [vmem:[%s300_s7 + $0x28] sm:$0xff]  ;;  %v322_v13 = vld [vmem:[%s300_s7 + $0x38] sm:$0xff]  ;;  %v335_v22 = vrot.slane %v314_v20, %v334_v21 }
  0x1b   : > { %349 = vperm.xlu1 %653, %v325_v4   ;;  %339 = vperm.xlu0 %652, %v323_v5   ;;  %v328_v11 = vmul.f32 0.666666, %v320_v9  ;;  %v327_v12 = vmul.f32 0.666666, %v319_v10  ;;  %v321_v14 = vld [vmem:[%s300_s7 + $0x30] sm:$0xff]  ;;  %v385_v26 = vld [vmem:[%s835_s13] sm:$0xff] }
  0x1c   : > { %v330_v15 = vmul.f32 0.666666, %v322_v13  ;;  %v329_v16 = vmul.f32 0.666666, %v321_v14  ;;  %v387_v24 = vld [vmem:[%s835_s13 + $0x10] sm:$0xff]  ;;  %v401_v30 = vld [vmem:[%s841_s22] sm:$0xff] }
  0x1d   : > { %v403_v29 = vld [vmem:[%s841_s22 + $0x10] sm:$0xff]  ;;  %v388_v34 = vld [vmem:[%s835_s13 + $0x18] sm:$0xff]  ;;  %v386_v36 = vld [vmem:[%s835_s13 + $0x8] sm:$0xff]  ;;  %s856_s29 = scalar_lea.vmem [#allocation2], %s578_s26  ;;  %s593_s30 = sshll.u32 %s722_s18, 10 }
  0x1e   : > { %v404_v41 = vld [vmem:[%s841_s22 + $0x18] sm:$0xff]  ;;  %v402_v42 = vld [vmem:[%s841_s22 + $0x8] sm:$0xff]  ;;  %v389_v50 = vld [vmem:[%s835_s13 + $0x20] sm:$0xff]  ;;  %s449_s5 = sshll.u32 %s856_s29, 4  ;;  %s875_s8 = scalar_lea.hbm %s932_s4, %s593_s30  ;;  %s877_s5 = int_to_ptr.vmem [resolvable:$true] %s449_s5 }
  0x1f   : > { %354 = vperm.xlu1 %653, %v326_v7   ;;  %344 = vperm.xlu0 %652, %v324_v8   ;;  %v390_v48 = vld [vmem:[%s835_s13 + $0x28] sm:$0xff]  ;;  %v405_v56 = vld [vmem:[%s841_s22 + $0x20] sm:$0xff]  ;;  %v392_v62 = vld [vmem:[%s835_s13 + $0x38] sm:$0xff]  ;;  %s883_s18 = scalar_lea.sflag [#allocation3], %s276_s24  ;;  %s654_s9 = scalar_lea.vmem %s877_s5, 1024 }
  0x20   : > { %v406_v55 = vld [vmem:[%s841_s22 + $0x28] sm:$0xff]  ;;  %v391_v0 = vld [vmem:[%s835_s13 + $0x30] sm:$0xff]  ;;  %v408_v5 = vld [vmem:[%s841_s22 + $0x38] sm:$0xff]  ;;  %p655_p12 = scmp.ne.s32.totalorder %s877_s5, %s654_s9  ;;  %s733_s10 = smov [#allocation2]  }
  0x21   : > { %v407_v6 = vld [vmem:[%s841_s22 + $0x30] sm:$0xff]  ;;  %s658_s11 = sshll.u32 %s733_s10, 4  ;;  %s659_s11 = int_to_ptr.vmem [resolvable:$false] %s658_s11 }
  0x22   : > { %p656_p13 = pnand %p655_p12, %p801_p4  ;;  %s660_s12 = scalar_lea.vmem %s659_s11, 2048 }
  0x23   : > { %364 = vperm.xlu1 %653, %v328_v11   ;;  %359 = vperm.xlu0 %652, %v327_v12   ;;  %p661_p1 = scmp.lt.s32.totalorder %s877_s5, %s659_s11  ;;  %p662_p2 = scmp.lt.s32.totalorder %s660_s12, %s654_s9 }
  0x24   : > { %p657_p0 = pneg %p656_p13 }
  0x25   : > { %p663_p3 = por %p662_p2, %p661_p1 }
  0x27   : > { %374 = vperm.xlu1 %653, %v330_v15   ;;  %369 = vperm.xlu0 %652, %v329_v16   ;;  %p664_p5 = pnand %p663_p3, %p657_p0 }
  0x96   : > { %v350_v23 = vpop.permute.xlu1 %349  ;;  %v340_v25 = vpop.permute.xlu0 %339 }
  0x97   : > { %v379_v27 = vadd.f32 %v350_v23, %v335_v22  ;;  %v377_v28 = vadd.f32 %v340_v25, %v335_v22 }
  0x99   : > { %v395_v31 = vmul.f32 %v387_v24, %v379_v27  ;;  %v393_v32 = vmul.f32 %v385_v26, %v377_v28 }
  0x9a   : > { %v355_v33 = vpop.permute.xlu1 %354  ;;  %v345_v35 = vpop.permute.xlu0 %344 }
  0x9b   : > { %v411_v37 = vadd.f32 %v403_v29, %v395_v31  ;;  %v409_v38 = vadd.f32 %v401_v30, %v393_v32  ;;  %v380_v39 = vadd.f32 %v355_v33, %v335_v22  ;;  %v378_v40 = vadd.f32 %v345_v35, %v335_v22 }
  0x9d   : > { %v419_v43 = vmax.f32 %v411_v37, 0.0  ;;  %v417_v44 = vmax.f32 %v409_v38, 0.0  ;;  %v396_v45 = vmul.f32 %v388_v34, %v380_v39  ;;  %v394_v46 = vmul.f32 %v386_v36, %v378_v40 }
  0x9e   : > { %v365_v47 = vpop.permute.xlu1 %364  ;;  %v360_v49 = vpop.permute.xlu0 %359 }
  0x9f   : > { %427 = vst [vmem:[%s856_s29 + $0x10] sm:$0xff] %v419_v43  ;;  %425 = vst [vmem:[%s856_s29] sm:$0xff] %v417_v44  ;;  %v412_v51 = vadd.f32 %v404_v41, %v396_v45  ;;  %v410_v52 = vadd.f32 %v402_v42, %v394_v46  ;;  %v382_v53 = vadd.f32 %v365_v47, %v335_v22 }
  0xa0   : > { %v381_v54 = vadd.f32 %v360_v49, %v335_v22 }
  0xa1   : > { %v420_v57 = vmax.f32 %v412_v51, 0.0  ;;  %v418_v58 = vmax.f32 %v410_v52, 0.0  ;;  %v398_v59 = vmul.f32 %v390_v48, %v382_v53 }
  0xa2   : > { %v397_v60 = vmul.f32 %v389_v50, %v381_v54  ;;  %v375_v61 = vpop.permute.xlu1 %374  ;;  %v370_v63 = vpop.permute.xlu0 %369 }
  0xa3   : > { %428 = vst [vmem:[%s856_s29 + $0x18] sm:$0xff] %v420_v57  ;;  %426 = vst [vmem:[%s856_s29 + $0x8] sm:$0xff] %v418_v58  ;;  %v414_v1 = vadd.f32 %v406_v55, %v398_v59  ;;  %v384_v3 = vadd.f32 %v375_v61, %v335_v22  ;;  %v383_v4 = vadd.f32 %v370_v63, %v335_v22 }
  0xa4   : > { %v413_v2 = vadd.f32 %v405_v56, %v397_v60 }
  0xa5   : > { %v422_v7 = vmax.f32 %v414_v1, 0.0  ;;  %v400_v9 = vmul.f32 %v392_v62, %v384_v3  ;;  %v399_v10 = vmul.f32 %v391_v0, %v383_v4 }
  0xa6   : > { %v421_v8 = vmax.f32 %v413_v2, 0.0 }
  0xa7   : > { %430 = vst [vmem:[%s856_s29 + $0x28] sm:$0xff] %v422_v7  ;;  %v416_v11 = vadd.f32 %v408_v5, %v400_v9  ;;  %v415_v12 = vadd.f32 %v407_v6, %v399_v10 }
  0xa8   : > { %429 = vst [vmem:[%s856_s29 + $0x20] sm:$0xff] %v421_v8 }
  0xa9   : > { %v424_v13 = vmax.f32 %v416_v11, 0.0  ;;  %v423_v14 = vmax.f32 %v415_v12, 0.0 }
  0xab   : > { %432 = vst [vmem:[%s856_s29 + $0x38] sm:$0xff] %v424_v13  ;;  %431 = vst [vmem:[%s856_s29 + $0x30] sm:$0xff] %v423_v14 }
  0xac   : > { %667 = shalt.err (!%p664_p5)
}
  0xad   : > { %s668_s13 = scalar_lea.hbm %s875_s8, 1024  ;;  %s672_s22 = scalar_lea.hbm %s932_s4, 2048 }
  0xae   : > { %p669_p6 = scmp.ne.s32.totalorder %s875_s8, %s668_s13  ;;  %p673_p10 = scmp.lt.s32.totalorder %s875_s8, %s932_s4 }
  0xaf   : > { %p674_p11 = scmp.lt.s32.totalorder %s672_s22, %s668_s13 }
  0xb0   : > { %p670_p7 = pnand %p669_p6, %p801_p4 }
  0xb1   : > { %p675_p12 = por %p674_p11, %p673_p10 }
  0xb2   : > { %p671_p9 = pneg %p670_p7 }
  0xb4   : > { %p676_p13 = pnand %p675_p12, %p671_p9 }
  0xb6   : > { %679 = shalt.err (!%p676_p13)
}
  0xb7   : > { %s734_s29 = smov 128   ;;  %s735_s30 = smov 8  }
  0xb8   : > { %594 = dma.vmem_to_hbm [thread:$0]  (%p801_p4), %s877_s5, 1024, %s875_s8, %s883_s18, %s734_s29, %s734_s29, %s735_s30  }
  0xb9 PF: > { %p600_p0 = scmp.ge.s32.totalorder %s730_s20, 2  ;;  %s464_s6 = sand.u32 1, %s710_s15  }
  0xba   : > { %s465_s7 = scalar_lea.sflag [#allocation3], %s464_s6 }
  0xbb   : > { %p597_p1 = pnand %p600_p0, %p808_p8 }
  0xbd   : > { %p598_p2 = pneg %p597_p1 }
  0xbf   : > { %705 = dma.done.wait (%p598_p2), %s465_s7, 1024  }
  0xc0   : > { %707 = vsyncadd (%p598_p2), %s465_s7, 4294966272  ;;  %s17_s20 = sadd.s32 1, %s730_s20   ;;  %s935_s15 = smov %s714_s16 }
  0xc1   : > { %p14_p3 = scmp.ge.s32.totalorder %s17_s20, 4   ;;  %s936_s16 = smov %s718_s17 }
  0xc2   : > { %s937_s17 = smov %s814_s28  ;;  %s938_s18 = smov %s726_s19 }
  0xc3   : > { %s939_s19 = smov %s941_s23  ;;  %16 = sbr.rel (!%p14_p3) target bundleno = 4 (0x4), region = 80 }
  0xc8   :  { %470 = vsyncpa [#allocation3], 1 }
  0xc9   :  { %472 = vsyncpa [#allocation3 + $0x1], 1 }

// kernel: _lambda_.8
= control target key start
LH: loop header
LB: loop body
LE: loop exit
PB: predicated region body
PF: predicated region fallthrough
CT: control target
= control target key end

     0   :  { %s591_s12 = smov 0   ;;  %s593_s13 = smov 0   ;;  %s650_s0 = inlined_call_operand.vmem [shape: f32[128,64], index: 0, kind: input, shape index: {}]   ;;  %s651_s1 = inlined_call_operand.vmem [shape: bf16[64,128], index: 1, kind: input, shape index: {}]   ;;  %s652_s2 = inlined_call_operand.vmem [shape: f32[1,128], index: 2, kind: input, shape index: {}]   ;;  %s653_s3 = inlined_call_operand.vmem [shape: f32[128,128], index: 3, kind: output, shape index: {}]  }
   0x1   :  { %s595_s14 = smov 0  }
   0x2 LB: > { %s25_s15 = sadd.s32 1, %s565_s13  ;;  %p471_p0 = scmp.ge.s32.totalorder %s569_s14, 1  ;;  %s569_s14 = sphi %s595_s14, %s13_s14   ;;  %s565_s13 = sphi %s593_s13, %s655_s13   ;;  %s561_s12 = sphi %s591_s12, %s654_s12  }
   0x3   : > { %p27_p1 = scmp.ge.s32.totalorder %s25_s15, 2  ;;  %p169_p2 = scmp.lt.s32.totalorder %s569_s14, 3 }
   0x5   : > { %s657_s15 = smov (%p27_p1, %s25_s15), 0  ;;  %p170_p3 = pnand %p471_p0, %p169_p2 }
   0x6   : > { %s472_s18 = sshll.u32 (!%p170_p3), %s561_s12, 3 }
   0x7   : > { %173 = sbr.rel (%p170_p3) target bundleno = 231 (0xe7), region = 32  ;;  %p204_p4 = scmp.lt.s32.totalorder (!%p170_p3), %s472_s18, 15 }
   0xc   : > { %v543_v0 = vld [vmem:[%s651_s1 + $0x18] sm:$0xff]   ;;  %v544_v1 = vld [vmem:[%s651_s1 + $0x10] sm:$0xff]   ;;  %s659_s18 = smov (!%p204_p4, %s472_s18), 15  ;;  %v545_v2 = vld [vmem:[%s651_s1 + $0x8] sm:$0xff]   ;;  %vm277_vm0 = vcmask 523264  }
   0xd   : > { %495 = vmatprep.subr.bf16.mxu0 %v543_v0  ;;  %511 = vmatprep.subr.bf16.mxu1 %v543_v0  ;;  %s473_s23 = sshll.u32 %s659_s18, 3  ;;  %v546_v6 = vld [vmem:[%s651_s1] sm:$0xff]  }
   0xe   : > { %496 = vmatpush3.bf16.msra.mxu0 %v543_v0  ;;  %515 = vmatpush3.bf16.msra.mxu1 %v543_v0  ;;  %s207_s26 = scalar_lea.vmem %s650_s0, %s473_s23  ;;  %v476_v16 = vld [vmem:[%s652_s2] ss:$0 sm:$0xff]  ;;  %s223_s6 = scalar_lea.vmem %s653_s3, %s473_s23 }
   0xf   : > { %497 = vmatprep.subr.bf16.mxu0 %v544_v1  ;;  %512 = vmatprep.subr.bf16.mxu1 %v544_v1  ;;  %v226_v3 = vld [vmem:[%s207_s26] sm:$0xff]  ;;  %v227_v4 = vld [vmem:[%s207_s26 + $0x8] sm:$0xff]  ;;  %v228_v10 = vld [vmem:[%s207_s26 + $0x10] sm:$0xff] }
  0x10   : > { %v230_v5 = vld [vmem:[%s207_s26 + $0x20] sm:$0xff]  ;;  %v234_v7 = vpack.c.bf16 %v227_v4, %v226_v3  ;;  %v231_v8 = vld [vmem:[%s207_s26 + $0x28] sm:$0xff]  ;;  %v229_v11 = vld [vmem:[%s207_s26 + $0x18] sm:$0xff] }
  0x11   : > { %v236_v9 = vpack.c.bf16 %v231_v8, %v230_v5  ;;  %v232_v12 = vld [vmem:[%s207_s26 + $0x30] sm:$0xff]  ;;  %v233_v13 = vld [vmem:[%s207_s26 + $0x38] sm:$0xff]  ;;  %v235_v14 = vpack.c.bf16 %v229_v11, %v228_v10 }
  0x12   : > { %498 = vmatpush3.bf16.msra.mxu0 %v544_v1  ;;  %516 = vmatpush3.bf16.msra.mxu1 %v544_v1  ;;  %v237_v15 = vpack.c.bf16 %v233_v13, %v232_v12 }
  0x13   : > { %499 = vmatprep.subr.bf16.mxu0 %v545_v2  ;;  %513 = vmatprep.subr.bf16.mxu1 %v545_v2 }
  0x14   : > { %503 = vmatprep.mubr.msk.bf16.mxu0 %vm277_vm0, %v234_v7  ;;  %507 = vmatprep.mubr.msk.bf16.mxu1 %vm277_vm0, %v236_v9 }
  0x16   : > { %500 = vmatpush3.bf16.msra.mxu0 %v545_v2  ;;  %517 = vmatpush3.bf16.msra.mxu1 %v545_v2 }
  0x17   : > { %501 = vmatprep.subr.bf16.mxu0 %v546_v6  ;;  %514 = vmatprep.subr.bf16.mxu1 %v546_v6 }
  0x1a   : > { %502 = vmatpush3.bf16.msra.mxu0 %v546_v6  ;;  %518 = vmatpush3.bf16.msra.mxu1 %v546_v6 }
  0x1d   : > { %504 = vmatmul.mubr.msk.bf16.vlgmr.msra.gmra.mxu0 %vm277_vm0, %v235_v14  ;;  %508 = vmatmul.mubr.msk.bf16.vlgmr.msra.gmra.mxu1 %vm277_vm0, %v237_v15 }
  0xdd   : > { %v505_v17 = vpop.f32.mrf.mxu0  ;;  %v509_v18 = vpop.f32.mrf.mxu1 }
  0xde   : > { %v333_v19 = vadd.f32 %v505_v17, %v476_v16  ;;  %v349_v20 = vadd.f32 %v509_v18, %v476_v16 }
  0xdf   : > { %v324_v21 = vpop.f32.mrf.mxu0  ;;  %v340_v22 = vpop.f32.mrf.mxu1 }
  0xe0   : > { %357 = vst [vmem:[%s223_s6 + $0x10] sm:$0xff] %v333_v19  ;;  %361 = vst [vmem:[%s223_s6 + $0x30] sm:$0xff] %v349_v20  ;;  %v325_v23 = vadd.f32 %v476_v16, %v324_v21  ;;  %v341_v24 = vadd.f32 %v476_v16, %v340_v22 }
  0xe1   : > { %v506_v25 = vpop.f32.mrf.mxu0  ;;  %v510_v26 = vpop.f32.mrf.mxu1 }
  0xe2   : > { %355 = vst [vmem:[%s223_s6] sm:$0xff] %v325_v23  ;;  %359 = vst [vmem:[%s223_s6 + $0x20] sm:$0xff] %v341_v24  ;;  %v336_v27 = vadd.f32 %v506_v25, %v476_v16  ;;  %v352_v28 = vadd.f32 %v510_v26, %v476_v16 }
  0xe3   : > { %v327_v29 = vpop.f32.mrf.mxu0  ;;  %v343_v30 = vpop.f32.mrf.mxu1 }
  0xe4   : > { %358 = vst [vmem:[%s223_s6 + $0x18] sm:$0xff] %v336_v27  ;;  %362 = vst [vmem:[%s223_s6 + $0x38] sm:$0xff] %v352_v28  ;;  %v328_v31 = vadd.f32 %v476_v16, %v327_v29  ;;  %v344_v32 = vadd.f32 %v476_v16, %v343_v30 }
  0xe6   : > { %356 = vst [vmem:[%s223_s6 + $0x8] sm:$0xff] %v328_v31  ;;  %360 = vst [vmem:[%s223_s6 + $0x28] sm:$0xff] %v344_v32 }
  0xe7 PF: > { %s13_s14 = sadd.s32 1, %s569_s14   ;;  %s654_s12 = smov %s565_s13 }
  0xe8   : > { %p10_p5 = scmp.ge.s32.totalorder %s13_s14, 4   ;;  %s655_s13 = smov %s657_s15 }
  0xea   :  { %12 = sbr.rel (!%p10_p5) target bundleno = 2 (0x2), region = 68 }

</bundles_post_ra>
